<compile_context>
chip_gen: v6e
topology: v6e:2x2x1
jax: 0.10.0
libtpu: 0.0.40
codegen_flags: <defaults>
</compile_context>

<pallas_src>
import functools
import math

import jax
import jax.numpy as jnp
from jax import lax
from jax.experimental import pallas as pl
from jax.experimental.pallas import tpu as pltpu

_LANE = 128


# ----------------------------------------------------------------------------
# Device-dependent static choices
# ----------------------------------------------------------------------------
@functools.lru_cache(maxsize=None)
def _use_bf16_exp():
    # bf16 EUP exists on v6e / v7x; keep f32 exp on v5e and older.
    try:
        kind = jax.devices()[0].device_kind.lower()
    except Exception:
        return False
    return any(tag in kind for tag in ("v6", "v7", "7x"))


@functools.lru_cache(maxsize=None)
def _vmem_limit_bytes():
    # Generation-aware scoped-VMEM limit: ~cap - 16 MiB, capped at 112 MiB.
    cap = 64 * 1024 * 1024  # conservative fallback (v7x per-TensorCore)
    try:
        info = pltpu.get_tpu_info()
        cap = int(getattr(info, "vmem_capacity_bytes", cap)) or cap
    except Exception:
        pass
    return int(min(max(cap - 16 * 1024 * 1024, 32 * 1024 * 1024),
                   112 * 1024 * 1024))


# ----------------------------------------------------------------------------
# Kernel 1: transform(x) = relu(x @ W^T + b)   (output zero-padded to 128 lanes)
# ----------------------------------------------------------------------------
def _transform_kernel(x_ref, wt_ref, b_ref, o_ref):
    y = jnp.dot(x_ref[...], wt_ref[...], preferred_element_type=jnp.float32)
    o_ref[...] = jnp.maximum(y + b_ref[...], 0.0)


def transform_pallas(x, w, b):
    # x: (N, Din), w: (Dout, Din) (PyTorch nn.Linear layout), b: (Dout,)
    # Returns (N, P) with P = Dout rounded up to 128 lanes; padded columns are
    # exactly zero (zero weights + zero bias + relu), so pairwise distances and
    # the diameter downstream are unaffected.
    N, Din = x.shape
    Dout = w.shape[0]
    P = max(_LANE, ((Dout + _LANE - 1) // _LANE) * _LANE)
    wt = jnp.zeros((Din, P), jnp.float32).at[:, :Dout].set(
        jnp.asarray(w, jnp.float32).T)
    brow = jnp.zeros((1, P), jnp.float32).at[:, :Dout].set(
        jnp.asarray(b, jnp.float32))
    return pl.pallas_call(
        _transform_kernel,
        out_shape=jax.ShapeDtypeStruct((N, P), jnp.float32),
        in_specs=[pl.BlockSpec(memory_space=pltpu.MemorySpace.VMEM)] * 3,
        out_specs=pl.BlockSpec(memory_space=pltpu.MemorySpace.VMEM),
    )(x.astype(jnp.float32), wt, brow)


# ----------------------------------------------------------------------------
# Kernel 2: batched debiased Sinkhorn divergence  S_eps(alpha, x, beta_k, y_k)
# ----------------------------------------------------------------------------
def _make_sinkhorn_kernel(p, eps_last, use_bf16_exp):
    p = int(p)
    eps_last = float(eps_last)
    if p not in (1, 2):
        raise NotImplementedError("only p in {1, 2} (geomloss defaults) supported")

    def exp_fn(z):
        # z <= 0 after max-stabilization -> bf16 exp is well conditioned.
        if use_bf16_exp:
            return jnp.exp(z.astype(jnp.bfloat16)).astype(jnp.float32)
        return jnp.exp(z)

    def kernel(n_ref, eps_ref, x_ref, y_ref, alr_ref, alc_ref, blr_ref,
               blc_ref, o_ref, fba_ref, gab_ref, faa_ref, gbb_ref):
        gidx = pl.program_id(0)            # which (y, beta) problem

        x = x_ref[...]                     # (N, P) f32
        y = y_ref[...]                     # (M, P) f32
        a_row = alr_ref[...]               # (1, N)  log alpha
        a_col = alc_ref[...]               # (N, 1)
        b_row = blr_ref[...]               # (1, M)  log beta
        b_col = blc_ref[...]               # (M, 1)

        # (R,1) -> (1,R) via a lane-broadcast + full-tile XLU transpose.
        # No resident identities, no MXU work (review item 1).
        def col_to_row(u):
            r = u.shape[0]
            t = jnp.transpose(jnp.broadcast_to(u, (r, _LANE)), (1, 0))
            return t[0:1, :]

        # ---- pairwise costs: squared norms hoisted, shared between matrices ----
        sq_x_col = jnp.sum(x * x, axis=1, keepdims=True)                 # (N,1)
        sq_y_col = jnp.sum(y * y, axis=1, keepdims=True)                 # (M,1)
        sq_x_row = col_to_row(sq_x_col)                                  # (1,N)
        sq_y_row = col_to_row(sq_y_col)                                  # (1,M)

        def gram(u, v):                    # u @ v^T, f32 accumulate
            return lax.dot_general(u, v, (((1,), (1,)), ((), ())),
                                   preferred_element_type=jnp.float32)

        def cost(d2):
            d2 = jnp.maximum(d2, 0.0)
            if p == 2:
                return 0.5 * d2
            # guard against 0 * rsqrt(0) on clamped-zero diagonals
            return jnp.sqrt(jnp.maximum(d2, 1e-20))

        # Main transport cost in f32 (its error is amplified by 1/blur**p at the
        # final extrapolation); debias Grams in bf16 (one-time MXU work).
        xb = x.astype(jnp.bfloat16)
        yb = y.astype(jnp.bfloat16)
        C_xy = cost(sq_x_col + sq_y_row - 2.0 * gram(x, y))              # (N,M)
        C_xx = cost(sq_x_col + sq_x_row - 2.0 * gram(xb, xb))            # (N,N)
        C_yy = cost(sq_y_col + sq_y_row - 2.0 * gram(yb, yb))            # (M,M)

        # softmin over columns (reduce axis 1): dual row -> result column.
        def softmin_rows(eps, negc, dual_row):
            z = dual_row + negc
            m = jnp.max(z, axis=1, keepdims=True)
            s = jnp.sum(exp_fn(z - m), axis=1, keepdims=True)
            return -eps * (m + jnp.log(s))                               # (R,1)

        # softmin over rows (reduce axis 0): dual column -> result row.
        # Used so C_yx = C_xy^T is never materialized.
        def softmin_cols(eps, negc, dual_col):
            z = dual_col + negc
            m = jnp.max(z, axis=0, keepdims=True)
            s = jnp.sum(exp_fn(z - m), axis=0, keepdims=True)
            return -eps * (m + jnp.log(s))                               # (1,S)

        # ---- initialization at the largest eps (geomloss sinkhorn_loop) ----
        eps0 = eps_ref[gidx, 0]
        inv0 = 1.0 / eps0
        negc_xy0 = C_xy * (-inv0)
        fba_ref[...] = softmin_rows(eps0, negc_xy0, b_row)               # (N,1)
        gab_ref[...] = softmin_cols(eps0, negc_xy0, a_col)               # (1,M)
        faa_ref[...] = softmin_rows(eps0, C_xx * (-inv0), a_row)         # (N,1)
        gbb_ref[...] = col_to_row(softmin_rows(eps0, C_yy * (-inv0), b_row))  # (1,M)

        # ---- eps-scaling annealing, symmetric averaged updates ----
        n_steps = n_ref[gidx]

        @pl.loop(0, n_steps)
        def _(step):
            eps = eps_ref[gidx, step]
            inv = 1.0 / eps
            # Hoisted scaled costs: each matrix scaled exactly once per step
            # (negc_xy shared by both xy-direction softmins) - review item 2.
            negc_xy = C_xy * (-inv)
            negc_xx = C_xx * (-inv)
            negc_yy = C_yy * (-inv)
            f_ba = fba_ref[...]
            g_ab = gab_ref[...]
            f_aa = faa_ref[...]
            g_bb = gbb_ref[...]
            f_aa_row = col_to_row(f_aa)
            ft_ba = softmin_rows(eps, negc_xy, b_row + g_ab * inv)
            gt_ab = softmin_cols(eps, negc_xy, a_col + f_ba * inv)
            ft_aa = softmin_rows(eps, negc_xx, a_row + f_aa_row * inv)
            gt_bb = col_to_row(softmin_rows(eps, negc_yy, b_row + g_bb * inv))
            fba_ref[...] = 0.5 * (f_ba + ft_ba)
            gab_ref[...] = 0.5 * (g_ab + gt_ab)
            faa_ref[...] = 0.5 * (f_aa + ft_aa)
            gbb_ref[...] = 0.5 * (g_bb + gt_bb)

        # ---- final extrapolation at eps = blur**p (static) ----
        inv = 1.0 / eps_last
        negc_xy = C_xy * (-inv)
        f_ba = fba_ref[...]
        g_ab = gab_ref[...]
        f_aa = faa_ref[...]
        g_bb = gbb_ref[...]
        f_ba_new = softmin_rows(eps_last, negc_xy, b_row + g_ab * inv)        # (N,1)
        g_ab_new = softmin_cols(eps_last, negc_xy, a_col + f_ba * inv)        # (1,M)
        f_aa_new = softmin_rows(eps_last, C_xx * (-inv),
                                a_row + col_to_row(f_aa) * inv)               # (N,1)
        g_bb_new = softmin_rows(eps_last, C_yy * (-inv), b_row + g_bb * inv)  # (M,1)

        # ---- debiased sinkhorn_cost: <a, f_ba - f_aa> + <b, g_ab - g_bb> ----
        a_w = jnp.exp(a_col)               # (N,1)
        b_w_row = jnp.exp(b_row)           # (1,M)
        b_w_col = jnp.exp(b_col)           # (M,1)
        o_ref[...] = (jnp.sum(a_w * (f_ba_new - f_aa_new), keepdims=True)
                      + jnp.sum(b_w_row * g_ab_new, keepdims=True)
                      - jnp.sum(b_w_col * g_bb_new, keepdims=True))

    return kernel


def _max_anneal_steps(blur, scaling, max_diameter):
    # static upper bound on len(arange(p*log(diam), p*log(blur), p*log(scaling)))
    return max(1, int(math.ceil(
        (math.log(max_diameter) - math.log(blur)) / (-math.log(scaling)))) + 1)


def _eps_schedule_device(diameter, p, blur, scaling, max_anneal):
    # geomloss.epsilon_schedule, per problem (diameter: (B,)), fixed max length:
    #   [diam**p] + exp(arange(p*log(diam), p*log(blur), p*log(scaling))) + [blur**p]
    B = diameter.shape[0]
    log_blur_p = p * math.log(blur)
    log_scale_p = p * math.log(scaling)
    log_diam_p = p * jnp.log(diameter)                                    # (B,)
    ar = jnp.arange(max_anneal, dtype=jnp.float32)                        # (L,)
    e = log_diam_p[:, None] + ar[None, :] * log_scale_p                   # (B,L)
    valid = e > log_blur_p
    n_anneal = jnp.sum(valid, axis=1).astype(jnp.int32)                   # (B,)
    n_steps = n_anneal + 2
    blur_p = float(blur) ** p
    sched = jnp.full((B, max_anneal + 2), blur_p, jnp.float32)
    sched = sched.at[:, 0].set(diameter ** p)
    sched = sched.at[:, 1:1 + max_anneal].set(jnp.where(valid, jnp.exp(e), blur_p))
    return n_steps, sched


def sinkhorn_divergence_batched(x, ys, a, bs, *, p, blur, scaling,
                                max_diameter=1e6):
    # x: (N,P) transformed points shared across the batch,
    # ys: (B,M,P) transformed points, a: (N,) weights, bs: (B,M) weights.
    # Returns (B,) divergences.  Fully jittable, no host sync.
    N, P = x.shape
    B, M, _ = ys.shape
    x = x.astype(jnp.float32)
    ys = ys.astype(jnp.float32)

    # on-device per-problem diameter + annealing schedule
    x_min = jnp.min(x, axis=0)
    x_max = jnp.max(x, axis=0)
    y_min = jnp.min(ys, axis=1)                                           # (B,P)
    y_max = jnp.max(ys, axis=1)
    mins = jnp.minimum(x_min[None, :], y_min)
    maxs = jnp.maximum(x_max[None, :], y_max)
    diameter = jnp.maximum(jnp.sqrt(jnp.sum((maxs - mins) ** 2, axis=1)), 1e-6)
    max_anneal = _max_anneal_steps(float(blur), float(scaling), float(max_diameter))
    n_steps, sched = _eps_schedule_device(diameter, p, float(blur),
                                          float(scaling), max_anneal)

    # clamp away exact zeros so log-weights never produce -inf / NaN
    a_log = jnp.log(jnp.maximum(jnp.asarray(a, jnp.float32), 1e-38))      # (N,)
    b_log = jnp.log(jnp.maximum(jnp.asarray(bs, jnp.float32), 1e-38))     # (B,M)

    kernel = _make_sinkhorn_kernel(p, float(blur) ** p, _use_bf16_exp())

    grid_spec = pltpu.PrefetchScalarGridSpec(
        num_scalar_prefetch=2,                                # n_steps, sched (SMEM)
        grid=(B,),
        in_specs=[
            pl.BlockSpec((N, P), lambda g, n, e: (0, 0)),     # x (shared, resident)
            pl.BlockSpec((None, M, P), lambda g, n, e: (g, 0, 0)),   # y_k
            pl.BlockSpec((1, N), lambda g, n, e: (0, 0)),     # log a (row)
            pl.BlockSpec((N, 1), lambda g, n, e: (0, 0)),     # log a (col)
            pl.BlockSpec((None, 1, M), lambda g, n, e: (g, 0, 0)),   # log b_k (row)
            pl.BlockSpec((None, M, 1), lambda g, n, e: (g, 0, 0)),   # log b_k (col)
        ],
        out_specs=pl.BlockSpec((None, 1, 1), lambda g, n, e: (g, 0, 0)),
        scratch_shapes=[pltpu.VMEM((N, 1), jnp.float32),      # f_ba
                        pltpu.VMEM((1, M), jnp.float32),      # g_ab
                        pltpu.VMEM((N, 1), jnp.float32),      # f_aa (col layout)
                        pltpu.VMEM((1, M), jnp.float32)],     # g_bb (row layout)
    )

    out = pl.pallas_call(
        kernel,
        out_shape=jax.ShapeDtypeStruct((B, 1, 1), jnp.float32),
        grid_spec=grid_spec,
        compiler_params=pltpu.CompilerParams(
            dimension_semantics=("parallel",),                # 2 problems -> 2 TCs on v7x
            vmem_limit_bytes=_vmem_limit_bytes()),
    )(n_steps, sched, x, ys,
      a_log.reshape(1, N), a_log.reshape(N, 1),
      b_log.reshape(B, 1, M), b_log.reshape(B, M, 1))
    return out[:, 0, 0]


# ----------------------------------------------------------------------------
# Forward path (jittable) + model wrapper mirroring NNSinkhornPRModel
# ----------------------------------------------------------------------------
def forward_pallas(w, b, d, si, sj, h, hi, hj, *, p, blur, scaling,
                   scaling_factor, max_diameter):
    nd, ni, nj = d.shape[0], si.shape[0], sj.shape[0]
    # one fused transform launch for d, si, sj (row concat)
    stacked = jnp.concatenate([jnp.asarray(d, jnp.float32),
                               jnp.asarray(si, jnp.float32),
                               jnp.asarray(sj, jnp.float32)], axis=0)
    tx = transform_pallas(stacked, w, b)
    tx_d = tx[:nd]
    tx_si = tx[nd:nd + ni]
    tx_sj = tx[nd + ni:]

    if ni == nj:
        # both divergences in one pallas_call, grid=(2,), parallel axis
        dists = sinkhorn_divergence_batched(
            tx_d, jnp.stack([tx_si, tx_sj], axis=0),
            h, jnp.stack([jnp.asarray(hi), jnp.asarray(hj)], axis=0),
            p=p, blur=blur, scaling=scaling, max_diameter=max_diameter)
        dist1, dist2 = dists[0], dists[1]
    else:
        dist1 = sinkhorn_divergence_batched(
            tx_d, tx_si[None], h, jnp.asarray(hi)[None],
            p=p, blur=blur, scaling=scaling, max_diameter=max_diameter)[0]
        dist2 = sinkhorn_divergence_batched(
            tx_d, tx_sj[None], h, jnp.asarray(hj)[None],
            p=p, blur=blur, scaling=scaling, max_diameter=max_diameter)[0]
    return jax.nn.sigmoid(scaling_factor * (dist2 - dist1))


class PallasNNSinkhornPRModel:
    def __init__(self, config, key):
        self.config = config
        D = config['D']
        kw, kb = jax.random.split(key)
        bound = 1.0 / math.sqrt(D)           # nn.Linear default init range
        self.w = jax.random.uniform(kw, (D, D), jnp.float32, -bound, bound)
        self.b = jax.random.uniform(kb, (D,), jnp.float32, -bound, bound)
        self._static = dict(p=config['p'], blur=float(config['blur']),
                            scaling=float(config['scaling']),
                            max_diameter=float(config.get('max_diameter', 1e6)))
        self._forward = jax.jit(functools.partial(
            forward_pallas,
            scaling_factor=float(config['scaling_factor']), **self._static))

    def transform(self, x):
        return transform_pallas(x, self.w, self.b)[:, :self.config['D']]

    def predict(self, d, si, h, hi):
        nd = d.shape[0]
        tx = transform_pallas(
            jnp.concatenate([jnp.asarray(d, jnp.float32),
                             jnp.asarray(si, jnp.float32)], axis=0),
            self.w, self.b)
        return sinkhorn_divergence_batched(
            tx[:nd], tx[nd:][None], h, jnp.asarray(hi)[None], **self._static)[0]

    def forward(self, d, si, sj, h, hi, hj):
        return self._forward(self.w, self.b, d, si, sj, h, hi, hj)


if __name__ == "__main__":
    config = {'D': 32, 'p': 2, 'blur': 0.05, 'scaling': 0.5,
              'scaling_factor': 1.0}
    N, M, D = 8, 8, config['D']

    key = jax.random.PRNGKey(0)
    kparam, kd, ksi, ksj, kh, khi, khj = jax.random.split(key, 7)

    model = PallasNNSinkhornPRModel(config, kparam)

    d = jax.random.normal(kd, (N, D), jnp.float32)
    si = jax.random.normal(ksi, (M, D), jnp.float32)
    sj = jax.random.normal(ksj, (M, D), jnp.float32)

    def make_weights(k, n):
        w = jax.random.uniform(k, (n,), jnp.float32, 0.5, 1.5)
        return w / jnp.sum(w)

    h = make_weights(kh, N)
    hi = make_weights(khi, M)
    hj = make_weights(khj, M)

    out = model.forward(d, si, sj, h, hi, hj)
    out = jax.block_until_ready(out)
    assert out.shape == () and jnp.isfinite(out)
    print("KERNEL_OK")
</pallas_src>

<mosaic_0001>
module attributes {stable_mosaic.version = 11 : i64} {
  func.func @_transform_kernel(%arg0: memref<24x32xf32, #tpu.memory_space<vmem>>, %arg1: memref<32x128xf32, #tpu.memory_space<vmem>>, %arg2: memref<1x128xf32, #tpu.memory_space<vmem>>, %arg3: memref<24x128xf32, #tpu.memory_space<vmem>>) attributes {dimension_semantics = [], scalar_prefetch = 0 : i64, scratch_operands = 0 : i64, tpu.core_type = #tpu.core_type<tc>} {
    %c0 = arith.constant 0 : index
    %c0_0 = arith.constant 0 : index
    %0 = vector.load %arg0[%c0, %c0_0] : memref<24x32xf32, #tpu.memory_space<vmem>>, vector<24x32xf32>
    %c0_1 = arith.constant 0 : index
    %c0_2 = arith.constant 0 : index
    %1 = vector.load %arg1[%c0_1, %c0_2] : memref<32x128xf32, #tpu.memory_space<vmem>>, vector<32x128xf32>
    %cst = arith.constant dense<0.000000e+00> : vector<24x128xf32>
    %2 = tpu.matmul %0, %1, %cst {dimension_numbers = #tpu.dot_dimension_numbers<[1], [0], [0], [1], [0, 0, 1, 1], [], []>} : vector<24x32xf32>, vector<32x128xf32>, vector<24x128xf32> -> vector<24x128xf32>
    %c0_3 = arith.constant 0 : index
    %c0_4 = arith.constant 0 : index
    %3 = vector.load %arg2[%c0_3, %c0_4] : memref<1x128xf32, #tpu.memory_space<vmem>>, vector<1x128xf32>
    %4 = vector.broadcast %3 : vector<1x128xf32> to vector<24x128xf32>
    %5 = arith.addf %2, %4 : vector<24x128xf32>
    %cst_5 = arith.constant 0.000000e+00 : f32
    %6 = vector.broadcast %cst_5 : f32 to vector<24x128xf32>
    %7 = arith.maximumf %5, %6 : vector<24x128xf32>
    %c0_6 = arith.constant 0 : index
    %c0_7 = arith.constant 0 : index
    %8 = vector.load %arg3[%c0_6, %c0_7] : memref<24x128xf32, #tpu.memory_space<vmem>>, vector<24x128xf32>
    tpu.vector_store %arg3[%c0_6, %c0_7], %7 {strides = array<i32>} : memref<24x128xf32, #tpu.memory_space<vmem>>, vector<24x128xf32>,
    return
  }
}

module attributes {stable_mosaic.version = 11 : i64} {
  func.func @kernel(%arg0: i32, %arg1: memref<2xi32, #tpu.memory_space<smem>>, %arg2: memref<2x28xf32, #tpu.memory_space<smem>>, %arg3: memref<8x128xf32, #tpu.memory_space<vmem>>, %arg4: memref<1x8x128xf32, #tpu.memory_space<vmem>>, %arg5: memref<1x8xf32, #tpu.memory_space<vmem>>, %arg6: memref<8x1xf32, #tpu.memory_space<vmem>>, %arg7: memref<1x1x8xf32, #tpu.memory_space<vmem>>, %arg8: memref<1x8x1xf32, #tpu.memory_space<vmem>>, %arg9: memref<1x1x1xf32, #tpu.memory_space<vmem>>, %arg10: memref<8x1xf32, #tpu.memory_space<vmem>>, %arg11: memref<1x8xf32, #tpu.memory_space<vmem>>, %arg12: memref<8x1xf32, #tpu.memory_space<vmem>>, %arg13: memref<1x8xf32, #tpu.memory_space<vmem>>) attributes {dimension_semantics = [#tpu.dimension_semantics<parallel>], iteration_bounds = array<i64: 2>, scalar_prefetch = 2 : i64, scratch_operands = 4 : i64, tpu.core_type = #tpu.core_type<tc>, window_params = [{pipeline_mode = #tpu.pipeline_mode<synchronous>, transform_indices = @transform_0, window_bounds = array<i64: 8, 128>}, {transform_indices = @transform_1, window_bounds = array<i64: 1, 8, 128>}, {pipeline_mode = #tpu.pipeline_mode<synchronous>, transform_indices = @transform_2, window_bounds = array<i64: 1, 8>}, {pipeline_mode = #tpu.pipeline_mode<synchronous>, transform_indices = @transform_3, window_bounds = array<i64: 8, 1>}, {transform_indices = @transform_4, window_bounds = array<i64: 1, 1, 8>}, {transform_indices = @transform_5, window_bounds = array<i64: 1, 8, 1>}, {transform_indices = @transform_6, window_bounds = array<i64: 1, 1, 1>}]} {
    %c0 = arith.constant 0 : index
    %c0_0 = arith.constant 0 : index
    %0 = vector.load %arg3[%c0, %c0_0] : memref<8x128xf32, #tpu.memory_space<vmem>>, vector<8x128xf32>
    %c0_1 = arith.constant 0 : index
    %c0_2 = arith.constant 0 : index
    %c0_3 = arith.constant 0 : index
    %1 = vector.load %arg4[%c0_1, %c0_2, %c0_3] : memref<1x8x128xf32, #tpu.memory_space<vmem>>, vector<1x8x128xf32>
    %2 = vector.shape_cast %1 : vector<1x8x128xf32> to vector<8x128xf32>
    %c0_4 = arith.constant 0 : index
    %c0_5 = arith.constant 0 : index
    %3 = vector.load %arg5[%c0_4, %c0_5] : memref<1x8xf32, #tpu.memory_space<vmem>>, vector<1x8xf32>
    %c0_6 = arith.constant 0 : index
    %c0_7 = arith.constant 0 : index
    %4 = vector.load %arg6[%c0_6, %c0_7] : memref<8x1xf32, #tpu.memory_space<vmem>>, vector<8x1xf32>
    %c0_8 = arith.constant 0 : index
    %c0_9 = arith.constant 0 : index
    %c0_10 = arith.constant 0 : index
    %5 = vector.load %arg7[%c0_8, %c0_9, %c0_10] : memref<1x1x8xf32, #tpu.memory_space<vmem>>, vector<1x1x8xf32>
    %6 = vector.shape_cast %5 : vector<1x1x8xf32> to vector<1x8xf32>
    %c0_11 = arith.constant 0 : index
    %c0_12 = arith.constant 0 : index
    %c0_13 = arith.constant 0 : index
    %7 = vector.load %arg8[%c0_11, %c0_12, %c0_13] : memref<1x8x1xf32, #tpu.memory_space<vmem>>, vector<1x8x1xf32>
    %8 = vector.shape_cast %7 : vector<1x8x1xf32> to vector<8x1xf32>
    %9 = arith.mulf %0, %0 : vector<8x128xf32>
    %cst = arith.constant dense<0.000000e+00> : vector<8xf32>
    %10 = vector.multi_reduction <add>, %9, %cst [1] : vector<8x128xf32> to vector<8xf32>
    %11 = vector.shape_cast %10 : vector<8xf32> to vector<8x1xf32>
    %12 = arith.mulf %2, %2 : vector<8x128xf32>
    %cst_14 = arith.constant dense<0.000000e+00> : vector<8xf32>
    %13 = vector.multi_reduction <add>, %12, %cst_14 [1] : vector<8x128xf32> to vector<8xf32>
    %14 = vector.shape_cast %13 : vector<8xf32> to vector<8x1xf32>
    %15 = vector.shape_cast %11 : vector<8x1xf32> to vector<8x1xf32>
    %16 = vector.broadcast %15 : vector<8x1xf32> to vector<8x128xf32>
    %17 = tpu.transpose %16, [1, 0] : vector<8x128xf32> -> vector<128x8xf32>
    %18 = vector.extract_strided_slice %17 {offsets = [0, 0], sizes = [1, 8], strides = [1, 1]} : vector<128x8xf32> to vector<1x8xf32>
    %19 = vector.shape_cast %14 : vector<8x1xf32> to vector<8x1xf32>
    %20 = vector.broadcast %19 : vector<8x1xf32> to vector<8x128xf32>
    %21 = tpu.transpose %20, [1, 0] : vector<8x128xf32> -> vector<128x8xf32>
    %22 = vector.extract_strided_slice %21 {offsets = [0, 0], sizes = [1, 8], strides = [1, 1]} : vector<128x8xf32> to vector<1x8xf32>
    %23 = arith.truncf %0 : vector<8x128xf32> to vector<8x128xbf16>
    %24 = arith.truncf %2 : vector<8x128xf32> to vector<8x128xbf16>
    %25 = vector.broadcast %11 : vector<8x1xf32> to vector<8x8xf32>
    %26 = vector.broadcast %22 : vector<1x8xf32> to vector<8x8xf32>
    %27 = arith.addf %25, %26 : vector<8x8xf32>
    %cst_15 = arith.constant dense<0.000000e+00> : vector<8x8xf32>
    %28 = tpu.matmul %0, %2, %cst_15 {dimension_numbers = #tpu.dot_dimension_numbers<[1], [1], [0], [0], [0, 0, 1, 0], [], []>} : vector<8x128xf32>, vector<8x128xf32>, vector<8x8xf32> -> vector<8x8xf32>
    %cst_16 = arith.constant 2.000000e+00 : f32
    %29 = vector.broadcast %cst_16 : f32 to vector<8x8xf32>
    %30 = arith.mulf %29, %28 : vector<8x8xf32>
    %31 = arith.subf %27, %30 : vector<8x8xf32>
    %cst_17 = arith.constant 0.000000e+00 : f32
    %32 = vector.broadcast %cst_17 : f32 to vector<8x8xf32>
    %33 = arith.maximumf %31, %32 : vector<8x8xf32>
    %cst_18 = arith.constant 5.000000e-01 : f32
    %34 = vector.broadcast %cst_18 : f32 to vector<8x8xf32>
    %35 = arith.mulf %34, %33 : vector<8x8xf32>
    %36 = vector.broadcast %11 : vector<8x1xf32> to vector<8x8xf32>
    %37 = vector.broadcast %18 : vector<1x8xf32> to vector<8x8xf32>
    %38 = arith.addf %36, %37 : vector<8x8xf32>
    %cst_19 = arith.constant dense<0.000000e+00> : vector<8x8xf32>
    %39 = tpu.matmul %23, %23, %cst_19 {dimension_numbers = #tpu.dot_dimension_numbers<[1], [1], [0], [0], [0, 0, 1, 0], [], []>} : vector<8x128xbf16>, vector<8x128xbf16>, vector<8x8xf32> -> vector<8x8xf32>
    %cst_20 = arith.constant 2.000000e+00 : f32
    %40 = vector.broadcast %cst_20 : f32 to vector<8x8xf32>
    %41 = arith.mulf %40, %39 : vector<8x8xf32>
    %42 = arith.subf %38, %41 : vector<8x8xf32>
    %cst_21 = arith.constant 0.000000e+00 : f32
    %43 = vector.broadcast %cst_21 : f32 to vector<8x8xf32>
    %44 = arith.maximumf %42, %43 : vector<8x8xf32>
    %cst_22 = arith.constant 5.000000e-01 : f32
    %45 = vector.broadcast %cst_22 : f32 to vector<8x8xf32>
    %46 = arith.mulf %45, %44 : vector<8x8xf32>
    %47 = vector.broadcast %14 : vector<8x1xf32> to vector<8x8xf32>
    %48 = vector.broadcast %22 : vector<1x8xf32> to vector<8x8xf32>
    %49 = arith.addf %47, %48 : vector<8x8xf32>
    %cst_23 = arith.constant dense<0.000000e+00> : vector<8x8xf32>
    %50 = tpu.matmul %24, %24, %cst_23 {dimension_numbers = #tpu.dot_dimension_numbers<[1], [1], [0], [0], [0, 0, 1, 0], [], []>} : vector<8x128xbf16>, vector<8x128xbf16>, vector<8x8xf32> -> vector<8x8xf32>
    %cst_24 = arith.constant 2.000000e+00 : f32
    %51 = vector.broadcast %cst_24 : f32 to vector<8x8xf32>
    %52 = arith.mulf %51, %50 : vector<8x8xf32>
    %53 = arith.subf %49, %52 : vector<8x8xf32>
    %cst_25 = arith.constant 0.000000e+00 : f32
    %54 = vector.broadcast %cst_25 : f32 to vector<8x8xf32>
    %55 = arith.maximumf %53, %54 : vector<8x8xf32>
    %cst_26 = arith.constant 5.000000e-01 : f32
    %56 = vector.broadcast %cst_26 : f32 to vector<8x8xf32>
    %57 = arith.mulf %56, %55 : vector<8x8xf32>
    %58 = arith.index_cast %arg0 : i32 to index
    %c0_27 = arith.constant 0 : index
    %59 = memref.load %arg2[%58, %c0_27] : memref<2x28xf32, #tpu.memory_space<smem>>
    %cst_28 = arith.constant 1.000000e+00 : f32
    %60 = arith.divf %cst_28, %59 : f32
    %cst_29 = arith.constant 0.000000e+00 : f32
    %61 = arith.subf %cst_29, %60 : f32
    %62 = vector.broadcast %61 : f32 to vector<8x8xf32>
    %63 = arith.mulf %35, %62 : vector<8x8xf32>
    %64 = vector.broadcast %6 : vector<1x8xf32> to vector<8x8xf32>
    %65 = arith.addf %64, %63 : vector<8x8xf32>
    %cst_30 = arith.constant dense<0xFF800000> : vector<8xf32>
    %66 = vector.multi_reduction <maximumf>, %65, %cst_30 [1] : vector<8x8xf32> to vector<8xf32>
    %67 = vector.shape_cast %66 : vector<8xf32> to vector<8x1xf32>
    %68 = vector.broadcast %67 : vector<8x1xf32> to vector<8x8xf32>
    %69 = arith.subf %65, %68 : vector<8x8xf32>
    %70 = math.exp %69 : vector<8x8xf32>
    %cst_31 = arith.constant dense<0.000000e+00> : vector<8xf32>
    %71 = vector.multi_reduction <add>, %70, %cst_31 [1] : vector<8x8xf32> to vector<8xf32>
    %72 = vector.shape_cast %71 : vector<8xf32> to vector<8x1xf32>
    %cst_32 = arith.constant 0.000000e+00 : f32
    %73 = arith.subf %cst_32, %59 : f32
    %74 = math.log %72 : vector<8x1xf32>
    %75 = arith.addf %67, %74 : vector<8x1xf32>
    %76 = vector.broadcast %73 : f32 to vector<8x1xf32>
    %77 = arith.mulf %76, %75 : vector<8x1xf32>
    %c0_33 = arith.constant 0 : index
    %c0_34 = arith.constant 0 : index
    %78 = vector.load %arg10[%c0_33, %c0_34] : memref<8x1xf32, #tpu.memory_space<vmem>>, vector<8x1xf32>
    tpu.vector_store %arg10[%c0_33, %c0_34], %77 {strides = array<i32>} : memref<8x1xf32, #tpu.memory_space<vmem>>, vector<8x1xf32>,
    %79 = vector.broadcast %4 : vector<8x1xf32> to vector<8x8xf32>
    %80 = arith.addf %79, %63 : vector<8x8xf32>
    %cst_35 = arith.constant dense<0xFF800000> : vector<8xf32>
    %81 = vector.multi_reduction <maximumf>, %80, %cst_35 [0] : vector<8x8xf32> to vector<8xf32>
    %82 = vector.shape_cast %81 : vector<8xf32> to vector<1x8xf32>
    %83 = vector.broadcast %82 : vector<1x8xf32> to vector<8x8xf32>
    %84 = arith.subf %80, %83 : vector<8x8xf32>
    %85 = math.exp %84 : vector<8x8xf32>
    %cst_36 = arith.constant dense<0.000000e+00> : vector<8xf32>
    %86 = vector.multi_reduction <add>, %85, %cst_36 [0] : vector<8x8xf32> to vector<8xf32>
    %87 = vector.shape_cast %86 : vector<8xf32> to vector<1x8xf32>
    %cst_37 = arith.constant 0.000000e+00 : f32
    %88 = arith.subf %cst_37, %59 : f32
    %89 = math.log %87 : vector<1x8xf32>
    %90 = arith.addf %82, %89 : vector<1x8xf32>
    %91 = vector.broadcast %88 : f32 to vector<1x8xf32>
    %92 = arith.mulf %91, %90 : vector<1x8xf32>
    %c0_38 = arith.constant 0 : index
    %c0_39 = arith.constant 0 : index
    %93 = vector.load %arg11[%c0_38, %c0_39] : memref<1x8xf32, #tpu.memory_space<vmem>>, vector<1x8xf32>
    tpu.vector_store %arg11[%c0_38, %c0_39], %92 {strides = array<i32>} : memref<1x8xf32, #tpu.memory_space<vmem>>, vector<1x8xf32>,
    %cst_40 = arith.constant 0.000000e+00 : f32
    %94 = arith.subf %cst_40, %60 : f32
    %95 = vector.broadcast %94 : f32 to vector<8x8xf32>
    %96 = arith.mulf %46, %95 : vector<8x8xf32>
    %97 = vector.broadcast %3 : vector<1x8xf32> to vector<8x8xf32>
    %98 = arith.addf %97, %96 : vector<8x8xf32>
    %cst_41 = arith.constant dense<0xFF800000> : vector<8xf32>
    %99 = vector.multi_reduction <maximumf>, %98, %cst_41 [1] : vector<8x8xf32> to vector<8xf32>
    %100 = vector.shape_cast %99 : vector<8xf32> to vector<8x1xf32>
    %101 = vector.broadcast %100 : vector<8x1xf32> to vector<8x8xf32>
    %102 = arith.subf %98, %101 : vector<8x8xf32>
    %103 = math.exp %102 : vector<8x8xf32>
    %cst_42 = arith.constant dense<0.000000e+00> : vector<8xf32>
    %104 = vector.multi_reduction <add>, %103, %cst_42 [1] : vector<8x8xf32> to vector<8xf32>
    %105 = vector.shape_cast %104 : vector<8xf32> to vector<8x1xf32>
    %cst_43 = arith.constant 0.000000e+00 : f32
    %106 = arith.subf %cst_43, %59 : f32
    %107 = math.log %105 : vector<8x1xf32>
    %108 = arith.addf %100, %107 : vector<8x1xf32>
    %109 = vector.broadcast %106 : f32 to vector<8x1xf32>
    %110 = arith.mulf %109, %108 : vector<8x1xf32>
    %c0_44 = arith.constant 0 : index
    %c0_45 = arith.constant 0 : index
    %111 = vector.load %arg12[%c0_44, %c0_45] : memref<8x1xf32, #tpu.memory_space<vmem>>, vector<8x1xf32>
    tpu.vector_store %arg12[%c0_44, %c0_45], %110 {strides = array<i32>} : memref<8x1xf32, #tpu.memory_space<vmem>>, vector<8x1xf32>,
    %cst_46 = arith.constant 0.000000e+00 : f32
    %112 = arith.subf %cst_46, %60 : f32
    %113 = vector.broadcast %112 : f32 to vector<8x8xf32>
    %114 = arith.mulf %57, %113 : vector<8x8xf32>
    %115 = vector.broadcast %6 : vector<1x8xf32> to vector<8x8xf32>
    %116 = arith.addf %115, %114 : vector<8x8xf32>
    %cst_47 = arith.constant dense<0xFF800000> : vector<8xf32>
    %117 = vector.multi_reduction <maximumf>, %116, %cst_47 [1] : vector<8x8xf32> to vector<8xf32>
    %118 = vector.shape_cast %117 : vector<8xf32> to vector<8x1xf32>
    %119 = vector.broadcast %118 : vector<8x1xf32> to vector<8x8xf32>
    %120 = arith.subf %116, %119 : vector<8x8xf32>
    %121 = math.exp %120 : vector<8x8xf32>
    %cst_48 = arith.constant dense<0.000000e+00> : vector<8xf32>
    %122 = vector.multi_reduction <add>, %121, %cst_48 [1] : vector<8x8xf32> to vector<8xf32>
    %123 = vector.shape_cast %122 : vector<8xf32> to vector<8x1xf32>
    %cst_49 = arith.constant 0.000000e+00 : f32
    %124 = arith.subf %cst_49, %59 : f32
    %125 = math.log %123 : vector<8x1xf32>
    %126 = arith.addf %118, %125 : vector<8x1xf32>
    %127 = vector.broadcast %124 : f32 to vector<8x1xf32>
    %128 = arith.mulf %127, %126 : vector<8x1xf32>
    %129 = vector.shape_cast %128 : vector<8x1xf32> to vector<8x1xf32>
    %130 = vector.broadcast %129 : vector<8x1xf32> to vector<8x128xf32>
    %131 = tpu.transpose %130, [1, 0] : vector<8x128xf32> -> vector<128x8xf32>
    %132 = vector.extract_strided_slice %131 {offsets = [0, 0], sizes = [1, 8], strides = [1, 1]} : vector<128x8xf32> to vector<1x8xf32>
    %c0_50 = arith.constant 0 : index
    %c0_51 = arith.constant 0 : index
    %133 = vector.load %arg13[%c0_50, %c0_51] : memref<1x8xf32, #tpu.memory_space<vmem>>, vector<1x8xf32>
    tpu.vector_store %arg13[%c0_50, %c0_51], %132 {strides = array<i32>} : memref<1x8xf32, #tpu.memory_space<vmem>>, vector<1x8xf32>,
    %134 = arith.index_cast %arg0 : i32 to index
    %135 = memref.load %arg1[%134] : memref<2xi32, #tpu.memory_space<smem>>
    %c0_i32 = arith.constant 0 : i32
    %136 = arith.subi %135, %c0_i32 : i32
    %c1_i32 = arith.constant 1 : i32
    %c1_i32_52 = arith.constant 1 : i32
    %137 = arith.subi %c1_i32, %c1_i32_52 : i32
    %138 = arith.addi %136, %137 : i32
    %c1_i32_53 = arith.constant 1 : i32
    %139 = arith.divsi %138, %c1_i32_53 : i32
    %c1_i32_54 = arith.constant 1 : i32
    %c0_i32_55 = arith.constant 0 : i32
    %c0_i32_56 = arith.constant 0 : i32
    %140 = arith.subi %139, %c0_i32_56 : i32
    %141 = arith.addi %c0_i32_56, %140 : i32
    %c1_i32_57 = arith.constant 1 : i32
    scf.for %arg14 = %c0_i32_56 to %141 step %c1_i32_57  : i32 {
      %247 = arith.muli %arg14, %c1_i32_54 : i32
      %248 = arith.addi %c0_i32_55, %247 : i32
      %249 = arith.index_cast %arg0 : i32 to index
      %250 = arith.index_cast %248 : i32 to index
      %251 = memref.load %arg2[%249, %250] : memref<2x28xf32, #tpu.memory_space<smem>>
      %cst_91 = arith.constant 1.000000e+00 : f32
      %252 = arith.divf %cst_91, %251 : f32
      %cst_92 = arith.constant 0.000000e+00 : f32
      %253 = arith.subf %cst_92, %252 : f32
      %254 = vector.broadcast %253 : f32 to vector<8x8xf32>
      %255 = arith.mulf %35, %254 : vector<8x8xf32>
      %cst_93 = arith.constant 0.000000e+00 : f32
      %256 = arith.subf %cst_93, %252 : f32
      %257 = vector.broadcast %256 : f32 to vector<8x8xf32>
      %258 = arith.mulf %46, %257 : vector<8x8xf32>
      %cst_94 = arith.constant 0.000000e+00 : f32
      %259 = arith.subf %cst_94, %252 : f32
      %260 = vector.broadcast %259 : f32 to vector<8x8xf32>
      %261 = arith.mulf %57, %260 : vector<8x8xf32>
      %c0_95 = arith.constant 0 : index
      %c0_96 = arith.constant 0 : index
      %262 = vector.load %arg10[%c0_95, %c0_96] : memref<8x1xf32, #tpu.memory_space<vmem>>, vector<8x1xf32>
      %c0_97 = arith.constant 0 : index
      %c0_98 = arith.constant 0 : index
      %263 = vector.load %arg11[%c0_97, %c0_98] : memref<1x8xf32, #tpu.memory_space<vmem>>, vector<1x8xf32>
      %c0_99 = arith.constant 0 : index
      %c0_100 = arith.constant 0 : index
      %264 = vector.load %arg12[%c0_99, %c0_100] : memref<8x1xf32, #tpu.memory_space<vmem>>, vector<8x1xf32>
      %c0_101 = arith.constant 0 : index
      %c0_102 = arith.constant 0 : index
      %265 = vector.load %arg13[%c0_101, %c0_102] : memref<1x8xf32, #tpu.memory_space<vmem>>, vector<1x8xf32>
      %266 = vector.shape_cast %264 : vector<8x1xf32> to vector<8x1xf32>
      %267 = vector.broadcast %266 : vector<8x1xf32> to vector<8x128xf32>
      %268 = tpu.transpose %267, [1, 0] : vector<8x128xf32> -> vector<128x8xf32>
      %269 = vector.extract_strided_slice %268 {offsets = [0, 0], sizes = [1, 8], strides = [1, 1]} : vector<128x8xf32> to vector<1x8xf32>
      %270 = vector.broadcast %252 : f32 to vector<1x8xf32>
      %271 = arith.mulf %263, %270 : vector<1x8xf32>
      %272 = arith.addf %6, %271 : vector<1x8xf32>
      %273 = vector.broadcast %272 : vector<1x8xf32> to vector<8x8xf32>
      %274 = arith.addf %273, %255 : vector<8x8xf32>
      %cst_103 = arith.constant dense<0xFF800000> : vector<8xf32>
      %275 = vector.multi_reduction <maximumf>, %274, %cst_103 [1] : vector<8x8xf32> to vector<8xf32>
      %276 = vector.shape_cast %275 : vector<8xf32> to vector<8x1xf32>
      %277 = vector.broadcast %276 : vector<8x1xf32> to vector<8x8xf32>
      %278 = arith.subf %274, %277 : vector<8x8xf32>
      %279 = math.exp %278 : vector<8x8xf32>
      %cst_104 = arith.constant dense<0.000000e+00> : vector<8xf32>
      %280 = vector.multi_reduction <add>, %279, %cst_104 [1] : vector<8x8xf32> to vector<8xf32>
      %281 = vector.shape_cast %280 : vector<8xf32> to vector<8x1xf32>
      %cst_105 = arith.constant 0.000000e+00 : f32
      %282 = arith.subf %cst_105, %251 : f32
      %283 = math.log %281 : vector<8x1xf32>
      %284 = arith.addf %276, %283 : vector<8x1xf32>
      %285 = vector.broadcast %282 : f32 to vector<8x1xf32>
      %286 = arith.mulf %285, %284 : vector<8x1xf32>
      %287 = vector.broadcast %252 : f32 to vector<8x1xf32>
      %288 = arith.mulf %262, %287 : vector<8x1xf32>
      %289 = arith.addf %4, %288 : vector<8x1xf32>
      %290 = vector.broadcast %289 : vector<8x1xf32> to vector<8x8xf32>
      %291 = arith.addf %290, %255 : vector<8x8xf32>
      %cst_106 = arith.constant dense<0xFF800000> : vector<8xf32>
      %292 = vector.multi_reduction <maximumf>, %291, %cst_106 [0] : vector<8x8xf32> to vector<8xf32>
      %293 = vector.shape_cast %292 : vector<8xf32> to vector<1x8xf32>
      %294 = vector.broadcast %293 : vector<1x8xf32> to vector<8x8xf32>
      %295 = arith.subf %291, %294 : vector<8x8xf32>
      %296 = math.exp %295 : vector<8x8xf32>
      %cst_107 = arith.constant dense<0.000000e+00> : vector<8xf32>
      %297 = vector.multi_reduction <add>, %296, %cst_107 [0] : vector<8x8xf32> to vector<8xf32>
      %298 = vector.shape_cast %297 : vector<8xf32> to vector<1x8xf32>
      %cst_108 = arith.constant 0.000000e+00 : f32
      %299 = arith.subf %cst_108, %251 : f32
      %300 = math.log %298 : vector<1x8xf32>
      %301 = arith.addf %293, %300 : vector<1x8xf32>
      %302 = vector.broadcast %299 : f32 to vector<1x8xf32>
      %303 = arith.mulf %302, %301 : vector<1x8xf32>
      %304 = vector.broadcast %252 : f32 to vector<1x8xf32>
      %305 = arith.mulf %269, %304 : vector<1x8xf32>
      %306 = arith.addf %3, %305 : vector<1x8xf32>
      %307 = vector.broadcast %306 : vector<1x8xf32> to vector<8x8xf32>
      %308 = arith.addf %307, %258 : vector<8x8xf32>
      %cst_109 = arith.constant dense<0xFF800000> : vector<8xf32>
      %309 = vector.multi_reduction <maximumf>, %308, %cst_109 [1] : vector<8x8xf32> to vector<8xf32>
      %310 = vector.shape_cast %309 : vector<8xf32> to vector<8x1xf32>
      %311 = vector.broadcast %310 : vector<8x1xf32> to vector<8x8xf32>
      %312 = arith.subf %308, %311 : vector<8x8xf32>
      %313 = math.exp %312 : vector<8x8xf32>
      %cst_110 = arith.constant dense<0.000000e+00> : vector<8xf32>
      %314 = vector.multi_reduction <add>, %313, %cst_110 [1] : vector<8x8xf32> to vector<8xf32>
      %315 = vector.shape_cast %314 : vector<8xf32> to vector<8x1xf32>
      %cst_111 = arith.constant 0.000000e+00 : f32
      %316 = arith.subf %cst_111, %251 : f32
      %317 = math.log %315 : vector<8x1xf32>
      %318 = arith.addf %310, %317 : vector<8x1xf32>
      %319 = vector.broadcast %316 : f32 to vector<8x1xf32>
      %320 = arith.mulf %319, %318 : vector<8x1xf32>
      %321 = vector.broadcast %252 : f32 to vector<1x8xf32>
      %322 = arith.mulf %265, %321 : vector<1x8xf32>
      %323 = arith.addf %6, %322 : vector<1x8xf32>
      %324 = vector.broadcast %323 : vector<1x8xf32> to vector<8x8xf32>
      %325 = arith.addf %324, %261 : vector<8x8xf32>
      %cst_112 = arith.constant dense<0xFF800000> : vector<8xf32>
      %326 = vector.multi_reduction <maximumf>, %325, %cst_112 [1] : vector<8x8xf32> to vector<8xf32>
      %327 = vector.shape_cast %326 : vector<8xf32> to vector<8x1xf32>
      %328 = vector.broadcast %327 : vector<8x1xf32> to vector<8x8xf32>
      %329 = arith.subf %325, %328 : vector<8x8xf32>
      %330 = math.exp %329 : vector<8x8xf32>
      %cst_113 = arith.constant dense<0.000000e+00> : vector<8xf32>
      %331 = vector.multi_reduction <add>, %330, %cst_113 [1] : vector<8x8xf32> to vector<8xf32>
      %332 = vector.shape_cast %331 : vector<8xf32> to vector<8x1xf32>
      %cst_114 = arith.constant 0.000000e+00 : f32
      %333 = arith.subf %cst_114, %251 : f32
      %334 = math.log %332 : vector<8x1xf32>
      %335 = arith.addf %327, %334 : vector<8x1xf32>
      %336 = vector.broadcast %333 : f32 to vector<8x1xf32>
      %337 = arith.mulf %336, %335 : vector<8x1xf32>
      %338 = vector.shape_cast %337 : vector<8x1xf32> to vector<8x1xf32>
      %339 = vector.broadcast %338 : vector<8x1xf32> to vector<8x128xf32>
      %340 = tpu.transpose %339, [1, 0] : vector<8x128xf32> -> vector<128x8xf32>
      %341 = vector.extract_strided_slice %340 {offsets = [0, 0], sizes = [1, 8], strides = [1, 1]} : vector<128x8xf32> to vector<1x8xf32>
      %342 = arith.addf %262, %286 : vector<8x1xf32>
      %cst_115 = arith.constant 5.000000e-01 : f32
      %343 = vector.broadcast %cst_115 : f32 to vector<8x1xf32>
      %344 = arith.mulf %343, %342 : vector<8x1xf32>
      %c0_116 = arith.constant 0 : index
      %c0_117 = arith.constant 0 : index
      %345 = vector.load %arg10[%c0_116, %c0_117] : memref<8x1xf32, #tpu.memory_space<vmem>>, vector<8x1xf32>
      tpu.vector_store %arg10[%c0_116, %c0_117], %344 {strides = array<i32>} : memref<8x1xf32, #tpu.memory_space<vmem>>, vector<8x1xf32>,
      %346 = arith.addf %263, %303 : vector<1x8xf32>
      %cst_118 = arith.constant 5.000000e-01 : f32
      %347 = vector.broadcast %cst_118 : f32 to vector<1x8xf32>
      %348 = arith.mulf %347, %346 : vector<1x8xf32>
      %c0_119 = arith.constant 0 : index
      %c0_120 = arith.constant 0 : index
      %349 = vector.load %arg11[%c0_119, %c0_120] : memref<1x8xf32, #tpu.memory_space<vmem>>, vector<1x8xf32>
      tpu.vector_store %arg11[%c0_119, %c0_120], %348 {strides = array<i32>} : memref<1x8xf32, #tpu.memory_space<vmem>>, vector<1x8xf32>,
      %350 = arith.addf %264, %320 : vector<8x1xf32>
      %cst_121 = arith.constant 5.000000e-01 : f32
      %351 = vector.broadcast %cst_121 : f32 to vector<8x1xf32>
      %352 = arith.mulf %351, %350 : vector<8x1xf32>
      %c0_122 = arith.constant 0 : index
      %c0_123 = arith.constant 0 : index
      %353 = vector.load %arg12[%c0_122, %c0_123] : memref<8x1xf32, #tpu.memory_space<vmem>>, vector<8x1xf32>
      tpu.vector_store %arg12[%c0_122, %c0_123], %352 {strides = array<i32>} : memref<8x1xf32, #tpu.memory_space<vmem>>, vector<8x1xf32>,
      %354 = arith.addf %265, %341 : vector<1x8xf32>
      %cst_124 = arith.constant 5.000000e-01 : f32
      %355 = vector.broadcast %cst_124 : f32 to vector<1x8xf32>
      %356 = arith.mulf %355, %354 : vector<1x8xf32>
      %c0_125 = arith.constant 0 : index
      %c0_126 = arith.constant 0 : index
      %357 = vector.load %arg13[%c0_125, %c0_126] : memref<1x8xf32, #tpu.memory_space<vmem>>, vector<1x8xf32>
      tpu.vector_store %arg13[%c0_125, %c0_126], %356 {strides = array<i32>} : memref<1x8xf32, #tpu.memory_space<vmem>>, vector<1x8xf32>,
    }
    %cst_58 = arith.constant -4.000000e+02 : f32
    %142 = vector.broadcast %cst_58 : f32 to vector<8x8xf32>
    %143 = arith.mulf %35, %142 : vector<8x8xf32>
    %c0_59 = arith.constant 0 : index
    %c0_60 = arith.constant 0 : index
    %144 = vector.load %arg10[%c0_59, %c0_60] : memref<8x1xf32, #tpu.memory_space<vmem>>, vector<8x1xf32>
    %c0_61 = arith.constant 0 : index
    %c0_62 = arith.constant 0 : index
    %145 = vector.load %arg11[%c0_61, %c0_62] : memref<1x8xf32, #tpu.memory_space<vmem>>, vector<1x8xf32>
    %c0_63 = arith.constant 0 : index
    %c0_64 = arith.constant 0 : index
    %146 = vector.load %arg12[%c0_63, %c0_64] : memref<8x1xf32, #tpu.memory_space<vmem>>, vector<8x1xf32>
    %c0_65 = arith.constant 0 : index
    %c0_66 = arith.constant 0 : index
    %147 = vector.load %arg13[%c0_65, %c0_66] : memref<1x8xf32, #tpu.memory_space<vmem>>, vector<1x8xf32>
    %cst_67 = arith.constant 4.000000e+02 : f32
    %148 = vector.broadcast %cst_67 : f32 to vector<1x8xf32>
    %149 = arith.mulf %145, %148 : vector<1x8xf32>
    %150 = arith.addf %6, %149 : vector<1x8xf32>
    %151 = vector.broadcast %150 : vector<1x8xf32> to vector<8x8xf32>
    %152 = arith.addf %151, %143 : vector<8x8xf32>
    %cst_68 = arith.constant dense<0xFF800000> : vector<8xf32>
    %153 = vector.multi_reduction <maximumf>, %152, %cst_68 [1] : vector<8x8xf32> to vector<8xf32>
    %154 = vector.shape_cast %153 : vector<8xf32> to vector<8x1xf32>
    %155 = vector.broadcast %154 : vector<8x1xf32> to vector<8x8xf32>
    %156 = arith.subf %152, %155 : vector<8x8xf32>
    %157 = math.exp %156 : vector<8x8xf32>
    %cst_69 = arith.constant dense<0.000000e+00> : vector<8xf32>
    %158 = vector.multi_reduction <add>, %157, %cst_69 [1] : vector<8x8xf32> to vector<8xf32>
    %159 = vector.shape_cast %158 : vector<8xf32> to vector<8x1xf32>
    %160 = math.log %159 : vector<8x1xf32>
    %161 = arith.addf %154, %160 : vector<8x1xf32>
    %cst_70 = arith.constant -2.500000e-03 : f32
    %162 = vector.broadcast %cst_70 : f32 to vector<8x1xf32>
    %163 = arith.mulf %162, %161 : vector<8x1xf32>
    %cst_71 = arith.constant 4.000000e+02 : f32
    %164 = vector.broadcast %cst_71 : f32 to vector<8x1xf32>
    %165 = arith.mulf %144, %164 : vector<8x1xf32>
    %166 = arith.addf %4, %165 : vector<8x1xf32>
    %167 = vector.broadcast %166 : vector<8x1xf32> to vector<8x8xf32>
    %168 = arith.addf %167, %143 : vector<8x8xf32>
    %cst_72 = arith.constant dense<0xFF800000> : vector<8xf32>
    %169 = vector.multi_reduction <maximumf>, %168, %cst_72 [0] : vector<8x8xf32> to vector<8xf32>
    %170 = vector.shape_cast %169 : vector<8xf32> to vector<1x8xf32>
    %171 = vector.broadcast %170 : vector<1x8xf32> to vector<8x8xf32>
    %172 = arith.subf %168, %171 : vector<8x8xf32>
    %173 = math.exp %172 : vector<8x8xf32>
    %cst_73 = arith.constant dense<0.000000e+00> : vector<8xf32>
    %174 = vector.multi_reduction <add>, %173, %cst_73 [0] : vector<8x8xf32> to vector<8xf32>
    %175 = vector.shape_cast %174 : vector<8xf32> to vector<1x8xf32>
    %176 = math.log %175 : vector<1x8xf32>
    %177 = arith.addf %170, %176 : vector<1x8xf32>
    %cst_74 = arith.constant -2.500000e-03 : f32
    %178 = vector.broadcast %cst_74 : f32 to vector<1x8xf32>
    %179 = arith.mulf %178, %177 : vector<1x8xf32>
    %cst_75 = arith.constant -4.000000e+02 : f32
    %180 = vector.broadcast %cst_75 : f32 to vector<8x8xf32>
    %181 = arith.mulf %46, %180 : vector<8x8xf32>
    %182 = vector.shape_cast %146 : vector<8x1xf32> to vector<8x1xf32>
    %183 = vector.broadcast %182 : vector<8x1xf32> to vector<8x128xf32>
    %184 = tpu.transpose %183, [1, 0] : vector<8x128xf32> -> vector<128x8xf32>
    %185 = vector.extract_strided_slice %184 {offsets = [0, 0], sizes = [1, 8], strides = [1, 1]} : vector<128x8xf32> to vector<1x8xf32>
    %cst_76 = arith.constant 4.000000e+02 : f32
    %186 = vector.broadcast %cst_76 : f32 to vector<1x8xf32>
    %187 = arith.mulf %185, %186 : vector<1x8xf32>
    %188 = arith.addf %3, %187 : vector<1x8xf32>
    %189 = vector.broadcast %188 : vector<1x8xf32> to vector<8x8xf32>
    %190 = arith.addf %189, %181 : vector<8x8xf32>
    %cst_77 = arith.constant dense<0xFF800000> : vector<8xf32>
    %191 = vector.multi_reduction <maximumf>, %190, %cst_77 [1] : vector<8x8xf32> to vector<8xf32>
    %192 = vector.shape_cast %191 : vector<8xf32> to vector<8x1xf32>
    %193 = vector.broadcast %192 : vector<8x1xf32> to vector<8x8xf32>
    %194 = arith.subf %190, %193 : vector<8x8xf32>
    %195 = math.exp %194 : vector<8x8xf32>
    %cst_78 = arith.constant dense<0.000000e+00> : vector<8xf32>
    %196 = vector.multi_reduction <add>, %195, %cst_78 [1] : vector<8x8xf32> to vector<8xf32>
    %197 = vector.shape_cast %196 : vector<8xf32> to vector<8x1xf32>
    %198 = math.log %197 : vector<8x1xf32>
    %199 = arith.addf %192, %198 : vector<8x1xf32>
    %cst_79 = arith.constant -2.500000e-03 : f32
    %200 = vector.broadcast %cst_79 : f32 to vector<8x1xf32>
    %201 = arith.mulf %200, %199 : vector<8x1xf32>
    %cst_80 = arith.constant -4.000000e+02 : f32
    %202 = vector.broadcast %cst_80 : f32 to vector<8x8xf32>
    %203 = arith.mulf %57, %202 : vector<8x8xf32>
    %cst_81 = arith.constant 4.000000e+02 : f32
    %204 = vector.broadcast %cst_81 : f32 to vector<1x8xf32>
    %205 = arith.mulf %147, %204 : vector<1x8xf32>
    %206 = arith.addf %6, %205 : vector<1x8xf32>
    %207 = vector.broadcast %206 : vector<1x8xf32> to vector<8x8xf32>
    %208 = arith.addf %207, %203 : vector<8x8xf32>
    %cst_82 = arith.constant dense<0xFF800000> : vector<8xf32>
    %209 = vector.multi_reduction <maximumf>, %208, %cst_82 [1] : vector<8x8xf32> to vector<8xf32>
    %210 = vector.shape_cast %209 : vector<8xf32> to vector<8x1xf32>
    %211 = vector.broadcast %210 : vector<8x1xf32> to vector<8x8xf32>
    %212 = arith.subf %208, %211 : vector<8x8xf32>
    %213 = math.exp %212 : vector<8x8xf32>
    %cst_83 = arith.constant dense<0.000000e+00> : vector<8xf32>
    %214 = vector.multi_reduction <add>, %213, %cst_83 [1] : vector<8x8xf32> to vector<8xf32>
    %215 = vector.shape_cast %214 : vector<8xf32> to vector<8x1xf32>
    %216 = math.log %215 : vector<8x1xf32>
    %217 = arith.addf %210, %216 : vector<8x1xf32>
    %cst_84 = arith.constant -2.500000e-03 : f32
    %218 = vector.broadcast %cst_84 : f32 to vector<8x1xf32>
    %219 = arith.mulf %218, %217 : vector<8x1xf32>
    %220 = math.exp %4 : vector<8x1xf32>
    %221 = math.exp %6 : vector<1x8xf32>
    %222 = math.exp %8 : vector<8x1xf32>
    %223 = arith.subf %163, %201 : vector<8x1xf32>
    %224 = arith.mulf %220, %223 : vector<8x1xf32>
    %225 = vector.shape_cast %224 : vector<8x1xf32> to vector<1x8x1xf32>
    %cst_85 = arith.constant dense<0.000000e+00> : vector<1xf32>
    %226 = vector.multi_reduction <add>, %225, %cst_85 [1, 2] : vector<1x8x1xf32> to vector<1xf32>
    %227 = vector.shape_cast %226 : vector<1xf32> to vector<1x1x1xf32>
    %228 = vector.extract %227[0, 0, 0] : f32 from vector<1x1x1xf32>
    %229 = vector.broadcast %228 : f32 to vector<1x1xf32>
    %230 = arith.mulf %221, %179 : vector<1x8xf32>
    %231 = vector.shape_cast %230 : vector<1x8xf32> to vector<1x1x8xf32>
    %cst_86 = arith.constant dense<0.000000e+00> : vector<1xf32>
    %232 = vector.multi_reduction <add>, %231, %cst_86 [1, 2] : vector<1x1x8xf32> to vector<1xf32>
    %233 = vector.shape_cast %232 : vector<1xf32> to vector<1x1x1xf32>
    %234 = vector.extract %233[0, 0, 0] : f32 from vector<1x1x1xf32>
    %235 = vector.broadcast %234 : f32 to vector<1x1xf32>
    %236 = arith.addf %229, %235 : vector<1x1xf32>
    %237 = arith.mulf %222, %219 : vector<8x1xf32>
    %238 = vector.shape_cast %237 : vector<8x1xf32> to vector<1x8x1xf32>
    %cst_87 = arith.constant dense<0.000000e+00> : vector<1xf32>
    %239 = vector.multi_reduction <add>, %238, %cst_87 [1, 2] : vector<1x8x1xf32> to vector<1xf32>
    %240 = vector.shape_cast %239 : vector<1xf32> to vector<1x1x1xf32>
    %241 = vector.extract %240[0, 0, 0] : f32 from vector<1x1x1xf32>
    %242 = vector.broadcast %241 : f32 to vector<1x1xf32>
    %243 = arith.subf %236, %242 : vector<1x1xf32>
    %c0_88 = arith.constant 0 : index
    %c0_89 = arith.constant 0 : index
    %c0_90 = arith.constant 0 : index
    %244 = vector.load %arg9[%c0_88, %c0_89, %c0_90] : memref<1x1x1xf32, #tpu.memory_space<vmem>>, vector<1x1x1xf32>
    %245 = vector.shape_cast %244 : vector<1x1x1xf32> to vector<1x1xf32>
    %246 = vector.shape_cast %243 : vector<1x1xf32> to vector<1x1x1xf32>
    tpu.vector_store %arg9[%c0_88, %c0_89, %c0_90], %246 {strides = array<i32>} : memref<1x1x1xf32, #tpu.memory_space<vmem>>, vector<1x1x1xf32>,
    return
  }
  func.func @transform_0(%arg0: i32, %arg1: memref<2xi32, #tpu.memory_space<smem>>, %arg2: memref<2x28xf32, #tpu.memory_space<smem>>) -> (i32, i32) {
    %c0_i32 = arith.constant 0 : i32
    %c0_i32_0 = arith.constant 0 : i32
    %c0_i32_1 = arith.constant 0 : i32
    return %c0_i32, %c0_i32_0 : i32, i32
  }
  func.func @transform_1(%arg0: i32, %arg1: memref<2xi32, #tpu.memory_space<smem>>, %arg2: memref<2x28xf32, #tpu.memory_space<smem>>) -> (i32, i32, i32) {
    %c0_i32 = arith.constant 0 : i32
    %c0_i32_0 = arith.constant 0 : i32
    %c0_i32_1 = arith.constant 0 : i32
    return %arg0, %c0_i32, %c0_i32_0 : i32, i32, i32
  }
  func.func @transform_2(%arg0: i32, %arg1: memref<2xi32, #tpu.memory_space<smem>>, %arg2: memref<2x28xf32, #tpu.memory_space<smem>>) -> (i32, i32) {
    %c0_i32 = arith.constant 0 : i32
    %c0_i32_0 = arith.constant 0 : i32
    %c0_i32_1 = arith.constant 0 : i32
    return %c0_i32, %c0_i32_0 : i32, i32
  }
  func.func @transform_3(%arg0: i32, %arg1: memref<2xi32, #tpu.memory_space<smem>>, %arg2: memref<2x28xf32, #tpu.memory_space<smem>>) -> (i32, i32) {
    %c0_i32 = arith.constant 0 : i32
    %c0_i32_0 = arith.constant 0 : i32
    %c0_i32_1 = arith.constant 0 : i32
    return %c0_i32, %c0_i32_0 : i32, i32
  }
  func.func @transform_4(%arg0: i32, %arg1: memref<2xi32, #tpu.memory_space<smem>>, %arg2: memref<2x28xf32, #tpu.memory_space<smem>>) -> (i32, i32, i32) {
    %c0_i32 = arith.constant 0 : i32
    %c0_i32_0 = arith.constant 0 : i32
    %c0_i32_1 = arith.constant 0 : i32
    return %arg0, %c0_i32, %c0_i32_0 : i32, i32, i32
  }
  func.func @transform_5(%arg0: i32, %arg1: memref<2xi32, #tpu.memory_space<smem>>, %arg2: memref<2x28xf32, #tpu.memory_space<smem>>) -> (i32, i32, i32) {
    %c0_i32 = arith.constant 0 : i32
    %c0_i32_0 = arith.constant 0 : i32
    %c0_i32_1 = arith.constant 0 : i32
    return %arg0, %c0_i32, %c0_i32_0 : i32, i32, i32
  }
  func.func @transform_6(%arg0: i32, %arg1: memref<2xi32, #tpu.memory_space<smem>>, %arg2: memref<2x28xf32, #tpu.memory_space<smem>>) -> (i32, i32, i32) {
    %c0_i32 = arith.constant 0 : i32
    %c0_i32_0 = arith.constant 0 : i32
    %c0_i32_1 = arith.constant 0 : i32
    return %arg0, %c0_i32, %c0_i32_0 : i32, i32, i32
  }
}

</mosaic_0001>

<bundles_post_ra>
// kernel: forward_pallas.2
= control target key start
LH: loop header
LB: loop body
LE: loop exit
PB: predicated region body
PF: predicated region fallthrough
CT: control target
= control target key end

     0   :  { %v166_v0 = vmov 0.0   ;;  %vm28_vm0 = vcmask 261120   ;;  %vm167_vm1 = vmmov 0   ;;  %s221_s1 = inlined_call_operand.vmem [shape: f32[32,128], index: 1, kind: input, shape index: {}]   ;;  %s222_s0 = inlined_call_operand.vmem [shape: f32[24,32], index: 0, kind: input, shape index: {}]   ;;  %s223_s2 = inlined_call_operand.vmem [shape: f32[1,128], index: 2, kind: input, shape index: {}]   ;;  %s224_s3 = inlined_call_operand.vmem [shape: f32[24,128], index: 3, kind: output, shape index: {}]  }
   0x1   :  { %156 = vmatprep.subr.mxu1 %v166_v0  ;;  %v20_v1 = vld [vmem:[%s221_s1 + $0x18] sm:$0xff]  ;;  %139 = vmatprep.subr.mxu0 %v166_v0  ;;  %v19_v2 = vld [vmem:[%s221_s1 + $0x10] sm:$0xff]  ;;  %v18_v3 = vld [vmem:[%s221_s1 + $0x8] sm:$0xff] }
   0x2   :  { %160 = vmatpush3.msra.mxu1 %v20_v1  ;;  %140 = vmatpush3.msra.mxu0 %v20_v1  ;;  %v17_v4 = vld [vmem:[%s221_s1] sm:$0xff]  ;;  %v15_v5 = vld [vmem:[%s222_s0 + $0x8] sm:$0xff]  ;;  %v16_v7 = vld [vmem:[%s222_s0 + $0x10] sm:$0xff] }
   0x3   :  { %157 = vmatprep.subr.mxu1 %v166_v0  ;;  %141 = vmatprep.subr.mxu0 %v166_v0  ;;  %v14_v6 = vld [vmem:[%s222_s0] sm:$0xff] }
   0x4   :  { %161 = vmatpush3.msra.mxu1 %v19_v2  ;;  %142 = vmatpush3.msra.mxu0 %v19_v2  ;;  %v128_v8 = vld [vmem:[%s223_s2] ss:$0 sm:$0xff] }
   0x5   :  { %158 = vmatprep.subr.mxu1 %v166_v0  ;;  %143 = vmatprep.subr.mxu0 %v166_v0 }
   0x6   :  { %162 = vmatpush3.msra.mxu1 %v18_v3  ;;  %144 = vmatpush3.msra.mxu0 %v18_v3 }
   0x7   :  { %159 = vmatprep.subr.mxu1 %v166_v0  ;;  %150 = vmatprep.mubr.msk.f32.mxu1 %vm167_vm1, %v166_v0 }
   0x8   :  { %163 = vmatpush3.msra.mxu1 %v17_v4  ;;  %145 = vmatprep.subr.mxu0 %v166_v0 }
   0x9   :  { %151 = vmatmul.mubr.msk.f32.vlgmr.msra.gmra.mxu1 %vm28_vm0, %v15_v5  ;;  %146 = vmatpush3.msra.mxu0 %v17_v4 }
   0xa   :  { %147 = vmatprep.mubr.msk.f32.mxu0 %vm167_vm1, %v166_v0  ;;  %153 = vmatprep.mubr.msk.f32.mxu1 %vm167_vm1, %v166_v0 }
   0xb   :  { %148 = vmatmul.mubr.msk.f32.vlgmr.msra.gmra.mxu0 %vm28_vm0, %v14_v6 }
   0xd   :  { %154 = vmatmul.mubr.msk.f32.gmra.mxu1 %vm28_vm0, %v16_v7 }
  0xc9   :  { %v109_v9 = vpop.f32.mrf.mxu1 }
  0xca   :  { %v110_v10 = vadd.f32 %v128_v8, %v109_v9 }
  0xcb   :  { %v104_v11 = vpop.f32.mrf.mxu0  ;;  %v152_v12 = vpop.f32.mrf.mxu1 }
  0xcc   :  { %v119_v13 = vmax.f32 %v110_v10, 0.0  ;;  %v105_v14 = vadd.f32 %v128_v8, %v104_v11 }
  0xcd   :  { %v149_v15 = vpop.f32.mrf.mxu0  ;;  %v114_v16 = vpop.f32.mrf.mxu1 }
  0xce   :  { %122 = vst [vmem:[%s224_s3 + $0x8] sm:$0xff] %v119_v13  ;;  %v118_v17 = vmax.f32 %v105_v14, 0.0  ;;  %v115_v18 = vadd.f32 %v128_v8, %v114_v16 }
  0xcf   :  { %v155_v19 = vpop.f32.mrf.mxu1 }
  0xd0   :  { %121 = vst [vmem:[%s224_s3] sm:$0xff] %v118_v17  ;;  %v120_v20 = vmax.f32 %v115_v18, 0.0 }
  0xd2   :  { %123 = vst [vmem:[%s224_s3 + $0x10] sm:$0xff] %v120_v20 }

// kernel: forward_pallas.3
= control target key start
LH: loop header
LB: loop body
LE: loop exit
PB: predicated region body
PF: predicated region fallthrough
CT: control target
= control target key end

     0   :  { %s1556_s0 = inlined_call_operand.vmem [shape: s32[2], index: 0, kind: input, shape index: {}]   ;;  %s1557_s2 = inlined_call_operand.vmem [shape: f32[8,128], index: 2, kind: input, shape index: {}]   ;;  %s1558_s3 = inlined_call_operand.vmem [shape: f32[2,8,128], index: 3, kind: input, shape index: {}]   ;;  %s1559_s4 = inlined_call_operand.vmem [shape: f32[1,8], index: 4, kind: input, shape index: {}]   ;;  %s1560_s5 = inlined_call_operand.vmem [shape: f32[8,1], index: 5, kind: input, shape index: {}]   ;;  %s1561_s6 = inlined_call_operand.vmem [shape: f32[2,1,8], index: 6, kind: input, shape index: {}]   ;;  %s1562_s7 = inlined_call_operand.vmem [shape: f32[2,8,1], index: 7, kind: input, shape index: {}]   ;;  %s1563_s8 = inlined_call_operand.vmem [shape: f32[2,1,1], index: 8, kind: output, shape index: {}]   ;;  %s1564_s1 = inlined_call_operand.vmem [shape: f32[2,28], index: 1, kind: input, shape index: {}]  }
   0x1   :  { %s13_s29 = sshll.u32 %s1556_s0, 4  ;;  %s17_s10 = sshll.u32 %s1564_s1, 4  ;;  %s14_s29 = int_to_ptr.vmem [resolvable:$true] %s13_s29  ;;  %s18_s10 = int_to_ptr.vmem [resolvable:$true] %s17_s10 }
   0x2   :  { %s1268_s11 = scalar_lea.vmem %s14_s29, 16  ;;  %p1273_p1 = scmp.lt.s32.totalorder %s14_s29, %s14_s29 }
   0x3   :  { %p1269_p0 = scmp.ne.s32.totalorder %s14_s29, %s1268_s11  ;;  %p1274_p2 = scmp.lt.s32.totalorder %s1268_s11, %s1268_s11 }
   0x5   :  { %p1275_p3 = por %p1274_p2, %p1273_p1 }
   0x7   :  { %p1276_p4 = pnand %p1275_p3, %p1269_p0 }
   0x9   :  { %1279 = shalt.err (!%p1276_p4)  }
   0xa   :  { %s1310_s12 = smov [#allocation7]   ;;  %s1280_s13 = scalar_lea.vmem %s18_s10, 32 }
   0xb   :  { %16 = dma.vmem_to_smem %s14_s29, 16, %s1310_s12, [#allocation6] }
   0xc   :  { %p1281_p5 = scmp.ne.s32.totalorder %s18_s10, %s1280_s13  ;;  %p1285_p6 = scmp.lt.s32.totalorder %s18_s10, %s18_s10 }
   0xd   :  { %p1286_p7 = scmp.lt.s32.totalorder %s1280_s13, %s1280_s13 }
   0xf   :  { %p1287_p8 = por %p1286_p7, %p1285_p6 }
  0x11   :  { %p1288_p9 = pnand %p1287_p8, %p1281_p5 }
  0x13   :  { %1291 = shalt.err (!%p1288_p9)  }
  0x14   :  { %s1311_s0 = smov [#allocation8]  }
  0x15   :  { %20 = dma.vmem_to_smem %s18_s10, 32, %s1311_s0, [#allocation6] }
  0x16   :  { %1300 = dma.done.wait [#allocation6], 48 }
  0x17   :  { %1301 = vsyncadd [#allocation6], 4294967248 }
  0x18   :  { %22 = sfence }
  0x19   :  { %s1367_s1 = smov 0  }
  0x1a LB: > { %s1373_s14 = sadd.s32 4294967295, %s1304_s1   ;;  %p1141_p10 = scmp.ge.s32.totalorder %s1304_s1, 1  ;;  %s1304_s1 = sphi %s1367_s1, %s28_s1  }
  0x1b   : > { %p240_p11 = scmp.lt.s32.totalorder %s1304_s1, 3 }
  0x1d   : > { %p241_p12 = pnand %p1141_p10, %p240_p11 }
  0x1e   : > { %p274_p13 = scmp.lt.s32.totalorder (!%p241_p12), %s1373_s14, 1  ;;  %s1144_s28 = sshll.u32 (!%p241_p12), %s1373_s14, 7 }
  0x1f   : > { %244 = sbr.rel (%p241_p12) target bundleno = 2150 (0x866), region = 44  ;;  %s1401_s29 = sld [smem:[#allocation8 + %s1144_s28]] (!%p241_p12) }
  0x20   : > { %s1453_s19 = sld [smem:[#allocation7 + %s1373_s14]] (!%p241_p12) }
  0x24   : > { %v289_v0 = vld [vmem:[%s1557_s2] sm:$0xff]  ;;  %v1312_v1 = vmov 0.0   ;;  %vm1313_vm0 = vmmov 0   ;;  %s1383_s17 = scalar_select %p274_p13, %s1373_s14, 1  ;;  %v1314_v12 = vmov 0   ;;  %v367_v23 = vlaneseq }
  0x25   : > { %1155 = vmatprep.subr.mxu0 %v1312_v1  ;;  %1157 = vmatprep.mubr.msk.f32.mxu0 %vm1313_vm0, %v1312_v1  ;;  %v365_v2 = vpack.c.bf16 %v289_v0, %v289_v0  ;;  %v295_v7 = vmul.f32 %v289_v0, %v289_v0  ;;  %v542_v8 = vstv %s1401_s29  ;;  %v1424_v46 = vld [vmem:[%s1559_s4] sm:$0x1]  ;;  %vm555_vm1 = vcmask 64512  }
  0x26   : > { %1160 = vmatprep.subr.bf16.mxu1 %v1312_v1  ;;  %1162 = vmatprep.mubr.msk.bf16.mxu1 %vm1313_vm0, %v1312_v1  ;;  %s1142_s18 = sshll.u32 %s1383_s17, 3  ;;  %s287_s21 = scalar_lea.vmem %s1563_s8, %s1383_s17  ;;  %1206 = vrcp.f32 %v542_v8  ;;  %v368_v24 = vshrl.u32 %v367_v23, 7  ;;  %v1439_v59 = vld [vmem:[%s1560_s5] sm:$0xff]  ;;  %vm600_vm2 = vcmask 57344   ;;  %vm571_vm3 = vcmask 7168  }
  0x27   : > { %1161 = vmatpush3.bf16.xpose.msra.mxu1 %v365_v2  ;;  %s277_s24 = scalar_lea.vmem %s1558_s3, %s1142_s18  ;;  %s284_s27 = scalar_lea.vmem %s1562_s7, %s1142_s18  ;;  %1205 = vset.pattern.permute.xlu0 %v1314_v12 }
  0x28   : > { %v290_v3 = vld [vmem:[%s277_s24] sm:$0xff]  ;;  %v1405_v25 = vsub.s32 0, %v368_v24  ;;  %s280_s11 = scalar_lea.vmem %s1561_s6, %s1383_s17  ;;  %s565_s18 = ssub.f32 0.0, %s1401_s29 }
  0x29   : > { %v1397_v4 = vld [vmem:[%s284_s27] sm:$0xff]  ;;  %v298_v5 = vmul.f32 %v290_v3, %v290_v3  ;;  %v366_v6 = vpack.c.bf16 %v290_v3, %v290_v3  ;;  %1156 = vmatpush3.xpose.msra.mxu0 %v290_v3  ;;  %p1145_p0 = scmp.le.s32.totalorder %s1453_s19, 0 }
  0x2a   : > { %1166 = vmatprep.subr.bf16.mxu0 %v1312_v1  ;;  %v1413_v37 = vld [vmem:[%s280_s11] sm:$0x1]  ;;  %v607_v53 = vrot.slane %v1424_v46, %v1405_v25  ;;  %s1460_s20 = smov (!%p1145_p0), 0  }
  0x2b   : > { %299 = vadd.xlane.f32.xlu0 %v298_v5  ;;  %v552_v45 = vrot.slane %v1413_v37, %v1405_v25 }
  0x2c   : > { %1158 = vmatmul.mubr.f32.vlgmr.msra.gmra.mxu0 %v289_v0 }
  0x2d   : > { %1167 = vmatpush3.bf16.xpose.msra.mxu0 %v366_v6  ;;  %1168 = vmatprep.mubr.msk.bf16.mxu0 %vm1313_vm0, %v1312_v1 }
  0x2e   : > { %1163 = vmatmul.mubr.bf16.vlgmr.msra.gmra.mxu1 %v365_v2 }
  0x2f   : > { %296 = vadd.xlane.f32.xlu0 %v295_v7 }
  0x33   : > { %v1207_v9 = vpop.eup %1206 }
  0x34   : > { %1169 = vmatmul.mubr.bf16.vlgmr.msra.gmra.mxu0 %v366_v6  ;;  %1172 = vpush %v1207_v9 }
  0x65   : > { %s1173_s30 = spop %1172 }
  0x66   : > { %s545_s12 = ssub.f32 0.0, %s1173_s30 }
  0x68   : > { %v546_v41 = vstv %s545_s12 }
  0xb4   : > { %v300_v10 = vpop.xlane.xlu0 %299 }
  0xb5   : > { %333 = vxpose.xlu1.b32.start.end [1/1] (short) (narrow) %v300_v10, 8 }
  0xb8   : > { %v297_v11 = vpop.xlane.xlu0 %296 }
  0xb9   : > { %301 = vxpose.xlu1.b32.start.end [1/1] (short) (narrow) %v297_v11, 8 }
  0xec   : > { %v438_v13 = vpop.f32.mrf.mxu0 }
  0xed   : > { %v442_v29 = vmul.f32 2.0, %v438_v13 }
  0xee   : > { %v485_v14 = vpop.f32.mrf.mxu1  ;;  %v1159_v15 = vpop.f32.mrf.mxu0 }
  0xef   : > { %v491_v36 = vmul.f32 2.0, %v485_v14 }
  0xf0   : > { %v1164_v16 = vpop.f32.mrf.mxu1 }
  0xf2   : > { %v488_v17 = vpop.f32.mrf.mxu1 }
  0xf4   : > { %v1165_v18 = vpop.f32.mrf.mxu1  ;;  %v530_v19 = vpop.f32.mrf.mxu0 }
  0xf5   : > { %v536_v27 = vmul.f32 2.0, %v530_v19 }
  0xf6   : > { %v1170_v20 = vpop.f32.mrf.mxu0 }
  0xf8   : > { %v533_v21 = vpop.f32.mrf.mxu0 }
  0xfa   : > { %v1171_v22 = vpop.f32.mrf.mxu0 }
 0x131   : > { %v349_v26 = vpop.trf.xlu1 }
 0x132   : > { %v370_v28 = vrot.slane %v349_v26, %v1405_v25 }
 0x134   : > { %v371_v30 = vadd.f32 %v370_v28, %v297_v11  ;;  %v495_v31 = vadd.f32 %v370_v28, %v300_v10 }
 0x135   : > { %v317_v32 = vpop.trf.xlu1 }
 0x136   : > { %v443_v33 = vsub.f32 %v371_v30, %v442_v29  ;;  %v537_v34 = vsub.f32 %v495_v31, %v536_v27  ;;  %v449_v35 = vrot.slane %v317_v32, %v1405_v25 }
 0x138   : > { %v450_v38 = vadd.f32 %v449_v35, %v297_v11  ;;  %v444_v39 = vmax.f32 %v443_v33, 0.0  ;;  %v538_v40 = vmax.f32 %v537_v34, 0.0  ;;  %v569_v35 = vstv %s565_s18 }
 0x13a   : > { %v492_v42 = vsub.f32 %v450_v38, %v491_v36  ;;  %v1415_v43 = vmul.f32 0.5, %v444_v39  ;;  %v1417_v44 = vmul.f32 0.5, %v538_v40 }
 0x13c   : > { %v493_v47 = vmax.f32 %v492_v42, 0.0  ;;  %v547_v48 = vmul.f32 %v546_v41, %v1415_v43  ;;  %v624_v49 = vmul.f32 %v546_v41, %v1417_v44 }
 0x13e   : > { %v1428_v50 = vmul.f32 0.5, %v493_v47  ;;  %v625_v51 = vadd.f32 %v624_v49, %v552_v45  ;;  %v554_v52 = vadd.f32 %v552_v45, %v547_v48 }
 0x140   : > { %v602_v54 = vmul.f32 %v546_v41, %v1428_v50  ;;  %v626_v55 = vsel %vm555_vm1, %v625_v51, -inf  ;;  %v556_v56 = vsel %vm555_vm1, %v554_v52, -inf }
 0x141   : > { %627 = vmax.xlane.f32.xlu0 %v626_v55  ;;  %557 = vmax.xlane.f32.xlu1 %v556_v56 }
 0x142   : > { %v609_v57 = vadd.f32 %v607_v53, %v602_v54 }
 0x144   : > { %v610_v58 = vsel %vm555_vm1, %v609_v57, -inf }
 0x145   : > { %611 = vmax.xlane.f32.xlu0 %v610_v58 }
 0x15b   : > { %575 = vperm.xlu0 %1205, %v1439_v59  }
 0x1ca   : > { %v628_v60 = vpop.xlane.xlu0 %627  ;;  %v558_v61 = vpop.xlane.xlu1 %557 }
 0x1cb   : > { %v629_v62 = vsub.f32 %v625_v51, %v628_v60  ;;  %v559_v63 = vsub.f32 %v554_v52, %v558_v61 }
 0x1cd   : > { %v630_v0 = vmul.f32 1.442695, %v629_v62  ;;  %v560_v1 = vmul.f32 1.442695, %v559_v63 }
 0x1ce   : > { %v1442_v2 = vpop.xlane.xlu0 %611 }
 0x1cf   : > { %1208 = vpow2.f32 %v630_v0  ;;  %v613_v3 = vsub.f32 %v609_v57, %v1442_v2 }
 0x1d0   : > { %1210 = vpow2.f32 %v560_v1 }
 0x1d1   : > { %v614_v5 = vmul.f32 1.442695, %v613_v3 }
 0x1d3   : > { %1212 = vpow2.f32 %v614_v5 }
 0x1d6   : > { %v576_v6 = vpop.permute.xlu0 %575 }
 0x1d7   : > { %v578_v7 = vadd.f32 %v576_v6, %v547_v48 }
 0x1d9   : > { %v579_v8 = vsel %vm555_vm1, %v578_v7, -inf }
 0x1da   : > { %v580_v9 = vrot.slane %v579_v8, 4 }
 0x1dc   : > { %v1209_v10 = vpop.eup %1208  ;;  %v581_v11 = vmax.f32 %v579_v8, %v580_v9 }
 0x1dd   : > { %v632_v13 = vsel %vm555_vm1, %v1209_v10, 0.0  ;;  %v1211_v14 = vpop.eup %1210 }
 0x1de   : > { %v582_v15 = vrot.slane %v581_v11, 2  ;;  %633 = vadd.xlane.f32.xlu1 %v632_v13  ;;  %v562_v17 = vsel %vm555_vm1, %v1211_v14, 0.0 }
 0x1e0   : > { %v583_v16 = vmax.f32 %v581_v11, %v582_v15  ;;  %v1213_v18 = vpop.eup %1212 }
 0x1e1   : > { %v616_v21 = vsel %vm555_vm1, %v1213_v18, 0.0 }
 0x1e2   : > { %v584_v19 = vrot.slane %v583_v16, 1  ;;  %563 = vadd.xlane.f32.xlu1 %v562_v17 }
 0x1e4   : > { %v585_v20 = vmax.f32 %v583_v16, %v584_v19 }
 0x1e6   : > { %v586_v22 = vsub.f32 %v578_v7, %v585_v20  ;;  %617 = vadd.xlane.f32.xlu1 %v616_v21 }
 0x1e8   : > { %v587_v23 = vmul.f32 1.442695, %v586_v22 }
 0x1ea   : > { %1214 = vpow2.f32 %v587_v23 }
 0x1f7   : > { %v1215_v24 = vpop.eup %1214 }
 0x1f8   : > { %v589_v26 = vsel %vm555_vm1, %v1215_v24, 0.0 }
 0x1f9   : > { %v590_v27 = vrot.slane %v589_v26, 4 }
 0x1fb   : > { %v591_v28 = vadd.f32 %v590_v27, %v589_v26 }
 0x1fd   : > { %v592_v29 = vrot.slane %v591_v28, 2 }
 0x1ff   : > { %v593_v30 = vadd.f32 %v592_v29, %v591_v28 }
 0x201   : > { %v594_v31 = vrot.slane %v593_v30, 1 }
 0x203   : > { %v595_v32 = vadd.f32 %v594_v31, %v593_v30 }
 0x205   : > { %1216 = vlog2.f32 %v595_v32 }
 0x212   : > { %v1217_v33 = vpop.eup %1216 }
 0x213   : > { %v597_v34 = vmul.f32 0.6931472, %v1217_v33 }
 0x215   : > { %v598_v36 = vadd.f32 %v597_v34, %v585_v20 }
 0x217   : > { %v599_v38 = vmul.f32 %v598_v36, %v569_v35 }
 0x219   : > { %601 = vst.msk [vmem:[#allocation3] sm:$0x1] %vm600_vm2, %v599_v38 }
 0x267   : > { %v634_v39 = vpop.xlane.xlu1 %633 }
 0x268   : > { %1218 = vlog2.f32 %v634_v39 }
 0x26b   : > { %v564_v40 = vpop.xlane.xlu1 %563 }
 0x26c   : > { %1220 = vlog2.f32 %v564_v40 }
 0x26f   : > { %v618_v41 = vpop.xlane.xlu1 %617 }
 0x270   : > { %1222 = vlog2.f32 %v618_v41 }
 0x275   : > { %v1219_v42 = vpop.eup %1218 }
 0x276   : > { %v636_v45 = vmul.f32 0.6931472, %v1219_v42 }
 0x278   : > { %v637_v47 = vadd.f32 %v636_v45, %v628_v60 }
 0x279   : > { %v1221_v48 = vpop.eup %1220 }
 0x27a   : > { %v567_v49 = vmul.f32 0.6931472, %v1221_v48  ;;  %v638_v51 = vmul.f32 %v637_v47, %v569_v35 }
 0x27c   : > { %v568_v52 = vadd.f32 %v567_v49, %v558_v61  ;;  %639 = vxpose.xlu1.b32.start.end [1/1] (short) (narrow) %v638_v51, 8 }
 0x27d   : > { %v1223_v53 = vpop.eup %1222 }
 0x27e   : > { %v570_v54 = vmul.f32 %v569_v35, %v568_v52  ;;  %v620_v55 = vmul.f32 0.6931472, %v1223_v53 }
 0x280   : > { %572 = vst.msk [vmem:[#allocation2] sm:$0xff] %vm571_vm3, %v570_v54  ;;  %v621_v56 = vadd.f32 %v620_v55, %v1442_v2 }
 0x282   : > { %v622_v57 = vmul.f32 %v621_v56, %v569_v35 }
 0x284   : > { %623 = vst.msk [vmem:[#allocation4] sm:$0xff] %vm571_vm3, %v622_v57 }
 0x2f5   : > { %1102 = sbr.rel (%p1145_p0) target bundleno = 1363 (0x553), region = 81 }
 0x2f8   : > { %v655_v58 = vpop.trf.xlu1 }
 0x2f9   : > { %671 = vst.msk [vmem:[#allocation5] sm:$0x1] %vm600_vm2, %v655_v58 }
 0x2fa LB: >> { %v1465_v60 = vld [vmem:[#allocation4] sm:$0xff]  ;;  %v1315_v61 = vmov 0   ;;  %s679_s22 = sshra.s32 %s1308_s20, 7  ;;  %s684_s23 = sand.u32 127, %s1308_s20  ;;  %v1474_v0 = vld [vmem:[#allocation3] sm:$0x1]  ;;  %s1308_s20 = sphi %s1460_s20, %s676_s20  }
 0x2fb   : >> { %1224 = vset.pattern.permute.xlu0 %v1315_v61  ;;  %1225 = vset.pattern.permute.xlu1 %v1315_v61  ;;  %s681_s24 = sadd.s32 %s1373_s14, %s679_s22  ;;  %v695_v33 = vld [vmem:[#allocation2] sm:$0xff]  ;;  %s676_s20 = sadd.s32 1, %s1308_s20  }
 0x2fc   : >> { %701 = vperm.xlu0 %1224, %v1465_v60   ;;  %s1146_s25 = sshll.u32 %s681_s24, 7  ;;  %p675_p1 = scmp.ge.s32.totalorder %s676_s20, %s1453_s19 }
 0x2fd   : >> { %s685_s26 = sadd.s32 %s1146_s25, %s684_s23 }
 0x2fe   : >> { %s1471_s27 = sld [smem:[#allocation8 + %s685_s26]] }
 0x300   : >> { %v1476_v1 = vld [vmem:[#allocation5] sm:$0x1] }
 0x304   : >> { %v687_v62 = vstv %s1471_s27  ;;  %s755_s30 = ssub.f32 0.0, %s1471_s27 }
 0x305   : >> { %1226 = vrcp.f32 %v687_v62 }
 0x306   : >> { %v759_v51 = vstv %s755_s30 }
 0x312   : >> { %v1227_v63 = vpop.eup %1226 }
 0x313   : >> { %1174 = vpush %v1227_v63 }
 0x344   : >> { %s1175_s28 = spop %1174 }
 0x345   : >> { %s690_s29 = ssub.f32 0.0, %s1175_s28  ;;  %v736_v2 = vstv %s1175_s28 }
 0x346   : >> { %v737_v3 = vmul.f32 %v736_v2, %v1474_v0  ;;  %v812_v5 = vmul.f32 %v736_v2, %v1476_v1  ;;  %v761_v34 = vmul.f32 %v736_v2, %v695_v33 }
 0x347   : >> { %v691_v6 = vstv %s690_s29 }
 0x348   : >> { %v694_v7 = vmul.f32 %v691_v6, %v1417_v44  ;;  %v813_v8 = vadd.f32 %v812_v5, %v1413_v37  ;;  %v692_v9 = vmul.f32 %v691_v6, %v1415_v43  ;;  %v738_v10 = vadd.f32 %v737_v3, %v1413_v37 }
 0x349   : >> { %v693_v29 = vmul.f32 %v691_v6, %v1428_v50  ;;  %v762_v35 = vadd.f32 %v761_v34, %v1439_v59 }
 0x34a   : >> { %v818_v11 = vrot.slane %v813_v8, %v1405_v25  ;;  %v743_v13 = vrot.slane %v738_v10, %v1405_v25 }
 0x34c   : >> { %v820_v14 = vadd.f32 %v818_v11, %v694_v7  ;;  %v745_v15 = vadd.f32 %v743_v13, %v692_v9 }
 0x34e   : >> { %v821_v16 = vsel %vm555_vm1, %v820_v14, -inf  ;;  %v746_v17 = vsel %vm555_vm1, %v745_v15, -inf }
 0x34f   : >> { %822 = vmax.xlane.f32.xlu1 %v821_v16 }
 0x353   : >> { %747 = vmax.xlane.f32.xlu1 %v746_v17 }
 0x377   : >> { %v702_v18 = vpop.permute.xlu0 %701 }
 0x378   : >> { %704 = vxpose.xlu0.b32.start.end [1/1] (short) (narrow) %v702_v18, 8 }
 0x3d8   : >> { %v1488_v19 = vpop.xlane.xlu1 %822 }
 0x3d9   : >> { %v824_v36 = vsub.f32 %v820_v14, %v1488_v19 }
 0x3db   : >> { %v825_v38 = vmul.f32 1.442695, %v824_v36 }
 0x3dc   : >> { %v748_v20 = vpop.xlane.xlu1 %747 }
 0x3dd   : >> { %v749_v21 = vsub.f32 %v745_v15, %v748_v20 }
 0x3df   : >> { %v750_v22 = vmul.f32 1.442695, %v749_v21 }
 0x3e1   : >> { %1228 = vpow2.f32 %v750_v22 }
 0x3e2   : >> { %1230 = vpow2.f32 %v825_v38 }
 0x3ee   : >> { %v1229_v23 = vpop.eup %1228 }
 0x3ef   : >> { %v752_v24 = vsel %vm555_vm1, %v1229_v23, 0.0  ;;  %v1231_v39 = vpop.eup %1230 }
 0x3f0   : >> { %753 = vadd.xlane.f32.xlu0 %v752_v24  ;;  %v827_v40 = vsel %vm555_vm1, %v1231_v39, 0.0 }
 0x3f4   : >> { %v720_v26 = vpop.trf.xlu0 }
 0x3f5   : >> { %v790_v27 = vmul.f32 %v736_v2, %v720_v26 }
 0x3f7   : >> { %v791_v28 = vadd.f32 %v790_v27, %v1424_v46 }
 0x3f9   : >> { %v796_v30 = vrot.slane %v791_v28, %v1405_v25 }
 0x3fb   : >> { %v798_v31 = vadd.f32 %v796_v30, %v693_v29 }
 0x3fd   : >> { %v799_v32 = vsel %vm555_vm1, %v798_v31, -inf }
 0x3fe   : >> { %800 = vmax.xlane.f32.xlu1 %v799_v32 }
 0x40f   : >> { %765 = vperm.xlu1 %1225, %v762_v35  }
 0x433   : >> { %828 = vadd.xlane.f32.xlu1 %v827_v40 }
 0x479   : >> { %v754_v41 = vpop.xlane.xlu0 %753 }
 0x47a   : >> { %1232 = vlog2.f32 %v754_v41 }
 0x487   : >> { %v801_v42 = vpop.xlane.xlu1 %800  ;;  %v1233_v47 = vpop.eup %1232 }
 0x488   : >> { %v802_v45 = vsub.f32 %v798_v31, %v801_v42  ;;  %v757_v48 = vmul.f32 0.6931472, %v1233_v47 }
 0x48a   : >> { %v803_v49 = vmul.f32 1.442695, %v802_v45  ;;  %v758_v53 = vadd.f32 %v757_v48, %v748_v20 }
 0x48b   : >> { %v766_v52 = vpop.permute.xlu1 %765 }
 0x48c   : >> { %1234 = vpow2.f32 %v803_v49  ;;  %v768_v54 = vadd.f32 %v766_v52, %v692_v9  ;;  %v760_v55 = vmul.f32 %v759_v51, %v758_v53 }
 0x48e   : >> { %v769_v56 = vsel %vm555_vm1, %v768_v54, -inf  ;;  %v866_v58 = vadd.f32 %v760_v55, %v695_v33 }
 0x48f   : >> { %v770_v57 = vrot.slane %v769_v56, 4 }
 0x490   : >> { %v867_v62 = vmul.f32 0.5, %v866_v58 }
 0x491   : >> { %v771_v61 = vmax.f32 %v769_v56, %v770_v57 }
 0x492   : >> { %868 = vst.msk [vmem:[#allocation2] sm:$0xff] %vm571_vm3, %v867_v62 }
 0x493   : >> { %v772_v63 = vrot.slane %v771_v61, 2 }
 0x495   : >> { %v773_v2 = vmax.f32 %v771_v61, %v772_v63 }
 0x497   : >> { %v774_v3 = vrot.slane %v773_v2, 1 }
 0x499   : >> { %v1235_v5 = vpop.eup %1234  ;;  %v775_v6 = vmax.f32 %v773_v2, %v774_v3 }
 0x49a   : >> { %v805_v7 = vsel %vm555_vm1, %v1235_v5, 0.0 }
 0x49b   : >> { %v776_v8 = vsub.f32 %v768_v54, %v775_v6  ;;  %806 = vadd.xlane.f32.xlu1 %v805_v7 }
 0x49d   : >> { %v777_v10 = vmul.f32 1.442695, %v776_v8 }
 0x49f   : >> { %1236 = vpow2.f32 %v777_v10 }
 0x4ac   : >> { %v1237_v9 = vpop.eup %1236 }
 0x4ad   : >> { %v779_v11 = vsel %vm555_vm1, %v1237_v9, 0.0 }
 0x4ae   : >> { %v780_v13 = vrot.slane %v779_v11, 4 }
 0x4b0   : >> { %v781_v14 = vadd.f32 %v780_v13, %v779_v11 }
 0x4b2   : >> { %v782_v15 = vrot.slane %v781_v14, 2 }
 0x4b4   : >> { %v783_v16 = vadd.f32 %v782_v15, %v781_v14 }
 0x4b6   : >> { %v784_v17 = vrot.slane %v783_v16, 1 }
 0x4b8   : >> { %v785_v18 = vadd.f32 %v784_v17, %v783_v16 }
 0x4ba   : >> { %1238 = vlog2.f32 %v785_v18 }
 0x4bc   : >> { %v829_v20 = vpop.xlane.xlu1 %828 }
 0x4bd   : >> { %1240 = vlog2.f32 %v829_v20 }
 0x4c7   : >> { %v1239_v21 = vpop.eup %1238 }
 0x4c8   : >> { %v787_v22 = vmul.f32 0.6931472, %v1239_v21 }
 0x4ca   : >> { %v1241_v23 = vpop.eup %1240  ;;  %v788_v24 = vadd.f32 %v787_v22, %v775_v6 }
 0x4cb   : >> { %v831_v26 = vmul.f32 0.6931472, %v1241_v23 }
 0x4cc   : >> { %v789_v27 = vmul.f32 %v788_v24, %v759_v51 }
 0x4cd   : >> { %v832_v28 = vadd.f32 %v831_v26, %v1488_v19 }
 0x4ce   : >> { %v869_v29 = vadd.f32 %v789_v27, %v1474_v0 }
 0x4cf   : >> { %v833_v30 = vmul.f32 %v832_v28, %v759_v51 }
 0x4d0   : >> { %v870_v31 = vmul.f32 0.5, %v869_v29 }
 0x4d1   : >> { %834 = vxpose.xlu1.b32.start.end [1/1] (short) (narrow) %v833_v30, 8 }
 0x4d2   : >> { %871 = vst.msk [vmem:[#allocation3] sm:$0x1] %vm600_vm2, %v870_v31 }
 0x524   : >> { %v807_v32 = vpop.xlane.xlu1 %806 }
 0x525   : >> { %1242 = vlog2.f32 %v807_v32 }
 0x532   : >> { %v1243_v33 = vpop.eup %1242 }
 0x533   : >> { %v809_v34 = vmul.f32 0.6931472, %v1243_v33 }
 0x535   : >> { %v810_v35 = vadd.f32 %v809_v34, %v801_v42 }
 0x537   : >> { %v811_v36 = vmul.f32 %v810_v35, %v759_v51 }
 0x539   : >> { %v872_v38 = vadd.f32 %v811_v36, %v1465_v60 }
 0x53b   : >> { %v873_v39 = vmul.f32 0.5, %v872_v38 }
 0x53d   : >> { %874 = vst.msk [vmem:[#allocation4] sm:$0xff] %vm571_vm3, %v873_v39 }
 0x54d   : >> { %v850_v40 = vpop.trf.xlu1 }
 0x54e   : >> { %v875_v19 = vadd.f32 %v850_v40, %v1476_v1  ;;  %678 = sbr.rel (!%p675_p1) target bundleno = 762 (0x2fa), region = 87 }
 0x550   : >> { %v876_v0 = vmul.f32 0.5, %v875_v19 }
 0x552   : >> { %877 = vst.msk [vmem:[#allocation5] sm:$0x1] %vm600_vm2, %v876_v0 }
 0x553 PF: > { %1244 = vset.pattern.permute.xlu0 %v1314_v12  ;;  %v881_v60 = vld [vmem:[#allocation4] sm:$0xff]  ;;  %v880_v41 = vld [vmem:[#allocation3] sm:$0x1]  ;;  %1245 = vset.pattern.permute.xlu1 %v1314_v12  ;;  %v878_v1 = vmul.f32 -400.0, %v1415_v43  ;;  %v934_v43 = vmul.f32 -400.0, %v1428_v50  ;;  %v994_v57 = vmul.f32 -400.0, %v1417_v44 }
 0x554   : > { %937 = vperm.xlu0 %1244, %v881_v60   ;;  %v883_v42 = vmul.f32 400.0, %v880_v41  ;;  %v879_v5 = vld [vmem:[#allocation2] sm:$0xff]  ;;  %v1019_v0 = vmul.f32 1.442695, %v1413_v37  ;;  %vm1062_vm4 = vcmask 0  }
 0x555   : > { %v905_v6 = vmul.f32 400.0, %v879_v5 }
 0x556   : > { %v884_v45 = vadd.f32 %v883_v42, %v1413_v37 }
 0x558   : > { %v889_v47 = vrot.slane %v884_v45, %v1405_v25 }
 0x559   : > { %v882_v52 = vld [vmem:[#allocation5] sm:$0x1] }
 0x55a   : > { %v891_v48 = vadd.f32 %v889_v47, %v878_v1  ;;  %v995_v53 = vmul.f32 400.0, %v882_v52  ;;  %v1017_v52 = vmul.f32 1.442695, %v1439_v59 }
 0x55c   : > { %v892_v49 = vsel %vm555_vm1, %v891_v48, -inf  ;;  %v996_v54 = vadd.f32 %v995_v53, %v1413_v37  ;;  %v1021_v37 = vmul.f32 1.442695, %v1397_v4 }
 0x55d   : > { %893 = vmax.xlane.f32.xlu1 %v892_v49 }
 0x55e   : > { %v1001_v58 = vrot.slane %v996_v54, %v1405_v25 }
 0x560   : > { %v1003_v63 = vadd.f32 %v1001_v58, %v994_v57 }
 0x562   : > { %v1004_v3 = vsel %vm555_vm1, %v1003_v63, -inf }
 0x5cf   : > { %v938_v51 = vpop.permute.xlu0 %937 }
 0x5d0   : > { %940 = vxpose.xlu0.b32.start.end [1/1] (short) (narrow) %v938_v51, 8 }
 0x5e6   : > { %v1529_v50 = vpop.xlane.xlu1 %893 }
 0x5e7   : > { %v895_v44 = vsub.f32 %v891_v48, %v1529_v50 }
 0x5e9   : > { %v896_v7 = vmul.f32 1.442695, %v895_v44 }
 0x5eb   : > { %1246 = vpow2.f32 %v896_v7 }
 0x64c   : > { %v956_v55 = vpop.trf.xlu0 }
 0x64d   : > { %v972_v12 = vmul.f32 400.0, %v956_v55 }
 0x64f   : > { %v973_v56 = vadd.f32 %v972_v12, %v1424_v46  ;;  %v906_v46 = vadd.f32 %v905_v6, %v1439_v59 }
 0x651   : > { %v978_v61 = vrot.slane %v973_v56, %v1405_v25  ;;  %v1247_v25 = vpop.eup %1246 }
 0x652   : > { %v898_v8 = vsel %vm555_vm1, %v1247_v25, 0.0 }
 0x653   : > { %v980_v62 = vadd.f32 %v978_v61, %v934_v43 }
 0x655   : > { %v981_v2 = vsel %vm555_vm1, %v980_v62, -inf }
 0x656   : > { %982 = vmax.xlane.f32.xlu1 %v981_v2 }
 0x65a   : > { %1005 = vmax.xlane.f32.xlu1 %v1004_v3 }
 0x66b   : > { %909 = vperm.xlu1 %1245, %v906_v46  }
 0x68f   : > { %899 = vadd.xlane.f32.xlu1 %v898_v8 }
 0x6df   : > { %v983_v10 = vpop.xlane.xlu1 %982 }
 0x6e0   : > { %v984_v9 = vsub.f32 %v980_v62, %v983_v10 }
 0x6e2   : > { %v985_v11 = vmul.f32 1.442695, %v984_v9 }
 0x6e3   : > { %v1533_v13 = vpop.xlane.xlu1 %1005 }
 0x6e4   : > { %1248 = vpow2.f32 %v985_v11  ;;  %v1007_v14 = vsub.f32 %v1003_v63, %v1533_v13 }
 0x6e6   : > { %v1008_v15 = vmul.f32 1.442695, %v1007_v14 }
 0x6e7   : > { %v910_v16 = vpop.permute.xlu1 %909 }
 0x6e8   : > { %1250 = vpow2.f32 %v1008_v15  ;;  %v912_v17 = vadd.f32 %v910_v16, %v878_v1 }
 0x6ea   : > { %v913_v18 = vsel %vm555_vm1, %v912_v17, -inf }
 0x6eb   : > { %v914_v20 = vrot.slane %v913_v18, 4 }
 0x6ed   : > { %v915_v21 = vmax.f32 %v913_v18, %v914_v20 }
 0x6ef   : > { %v916_v22 = vrot.slane %v915_v21, 2 }
 0x6f1   : > { %v1249_v23 = vpop.eup %1248  ;;  %v917_v24 = vmax.f32 %v915_v21, %v916_v22 }
 0x6f2   : > { %v987_v26 = vsel %vm555_vm1, %v1249_v23, 0.0 }
 0x6f3   : > { %988 = vadd.xlane.f32.xlu0 %v987_v26  ;;  %v918_v27 = vrot.slane %v917_v24, 1 }
 0x6f5   : > { %v1251_v28 = vpop.eup %1250  ;;  %v919_v29 = vmax.f32 %v917_v24, %v918_v27 }
 0x6f6   : > { %v1010_v30 = vsel %vm555_vm1, %v1251_v28, 0.0 }
 0x6f7   : > { %1011 = vadd.xlane.f32.xlu1 %v1010_v30  ;;  %v920_v31 = vsub.f32 %v912_v17, %v919_v29 }
 0x6f9   : > { %v921_v32 = vmul.f32 1.442695, %v920_v31 }
 0x6fb   : > { %1252 = vpow2.f32 %v921_v32 }
 0x708   : > { %v1253_v33 = vpop.eup %1252 }
 0x709   : > { %v923_v34 = vsel %vm555_vm1, %v1253_v33, 0.0 }
 0x70a   : > { %v924_v35 = vrot.slane %v923_v34, 4 }
 0x70c   : > { %v925_v36 = vadd.f32 %v924_v35, %v923_v34 }
 0x70e   : > { %v926_v38 = vrot.slane %v925_v36, 2 }
 0x710   : > { %v927_v39 = vadd.f32 %v926_v38, %v925_v36 }
 0x712   : > { %v928_v40 = vrot.slane %v927_v39, 1 }
 0x714   : > { %v929_v19 = vadd.f32 %v928_v40, %v927_v39 }
 0x716   : > { %1254 = vlog2.f32 %v929_v19 }
 0x717   : > { %1256 = vpow2.f32 %v1019_v0 }
 0x718   : > { %v900_v49 = vpop.xlane.xlu1 %899 }
 0x719   : > { %1258 = vlog2.f32 %v900_v49 }
 0x723   : > { %v1255_v60 = vpop.eup %1254 }
 0x724   : > { %v931_v41 = vmul.f32 0.6931472, %v1255_v60  ;;  %v1257_v1 = vpop.eup %1256 }
 0x726   : > { %v932_v42 = vadd.f32 %v931_v41, %v919_v29  ;;  %v1259_v54 = vpop.eup %1258 }
 0x727   : > { %v902_v55 = vmul.f32 0.6931472, %v1259_v54 }
 0x728   : > { %v933_v45 = vmul.f32 -0.0025, %v932_v42 }
 0x729   : > { %v903_v43 = vadd.f32 %v902_v55, %v1529_v50 }
 0x72a   : > { %v1036_v47 = vmul.f32 %v1257_v1, %v933_v45 }
 0x72b   : > { %v904_v62 = vmul.f32 -0.0025, %v903_v43 }
 0x72c   : > { %v1037_v48 = vsel %vm600_vm2, %v1036_v47, 0.0 }
 0x72d   : > { %1038 = vadd.xlane.f32.xlu1 %v1037_v48 }
 0x77c   : > { %v989_v51 = vpop.xlane.xlu0 %988 }
 0x77d   : > { %1260 = vlog2.f32 %v989_v51 }
 0x780   : > { %v1012_v53 = vpop.xlane.xlu1 %1011 }
 0x781   : > { %1262 = vlog2.f32 %v1012_v53 }
 0x782   : > { %1264 = vpow2.f32 %v1017_v52 }
 0x783   : > { %1266 = vpow2.f32 %v1021_v37 }
 0x78a   : > { %v1261_v12 = vpop.eup %1260 }
 0x78b   : > { %v991_v56 = vmul.f32 0.6931472, %v1261_v12 }
 0x78d   : > { %v992_v57 = vadd.f32 %v991_v56, %v983_v10 }
 0x78e   : > { %v1263_v58 = vpop.eup %1262 }
 0x78f   : > { %v1014_v61 = vmul.f32 0.6931472, %v1263_v58  ;;  %v993_v63 = vmul.f32 -0.0025, %v992_v57  ;;  %v1265_v2 = vpop.eup %1264 }
 0x790   : > { %v1267_v5 = vpop.eup %1266 }
 0x791   : > { %v1023_v3 = vsub.f32 %v904_v62, %v993_v63  ;;  %v1015_v59 = vadd.f32 %v1014_v61, %v1533_v13 }
 0x793   : > { %v1024_v6 = vmul.f32 %v1265_v2, %v1023_v3  ;;  %v1016_v4 = vmul.f32 -0.0025, %v1015_v59 }
 0x795   : > { %v1025_v46 = vsel %vm571_vm3, %v1024_v6, 0.0  ;;  %v1049_v44 = vmul.f32 %v1267_v5, %v1016_v4 }
 0x796   : > { %1026 = vadd.xlane.f32.xlu1 %v1025_v46 }
 0x797   : > { %v1050_v7 = vsel %vm571_vm3, %v1049_v44, 0.0 }
 0x79a   : > { %1051 = vadd.xlane.f32.xlu1 %v1050_v7 }
 0x7b6   : > { %v1039_v50 = vpop.xlane.xlu1 %1038 }
 0x7b7   : > { %v1040_v25 = vrot.slane %v1039_v50, 4 }
 0x7b9   : > { %v1041_v8 = vadd.f32 %v1040_v25, %v1039_v50 }
 0x7bb   : > { %v1042_v10 = vrot.slane %v1041_v8, 2 }
 0x7bd   : > { %v1043_v16 = vadd.f32 %v1042_v10, %v1041_v8 }
 0x7bf   : > { %v1044_v21 = vrot.slane %v1043_v16, 1 }
 0x7c1   : > { %v1045_v27 = vadd.f32 %v1044_v21, %v1043_v16 }
 0x81f   : > { %v1027_v9 = vpop.xlane.xlu1 %1026 }
 0x820   : > { %v1028_v11 = vrot.slane %v1027_v9, 4 }
 0x822   : > { %v1029_v14 = vadd.f32 %v1028_v11, %v1027_v9 }
 0x823   : > { %v1052_v15 = vpop.xlane.xlu1 %1051 }
 0x824   : > { %v1030_v13 = vrot.slane %v1029_v14, 2  ;;  %v1053_v17 = vrot.slane %v1052_v15, 4 }
 0x826   : > { %v1054_v18 = vadd.f32 %v1053_v17, %v1052_v15  ;;  %v1031_v20 = vadd.f32 %v1030_v13, %v1029_v14 }
 0x828   : > { %v1055_v22 = vrot.slane %v1054_v18, 2  ;;  %v1032_v23 = vrot.slane %v1031_v20, 1 }
 0x82a   : > { %v1056_v24 = vadd.f32 %v1055_v22, %v1054_v18  ;;  %v1033_v26 = vadd.f32 %v1032_v23, %v1031_v20 }
 0x82c   : > { %1176 = vpush %v1033_v26  ;;  %v1057_v28 = vrot.slane %v1056_v24, 1 }
 0x82d   : > { %1178 = vpush %v1045_v27 }
 0x82e   : > { %v1058_v29 = vadd.f32 %v1057_v28, %v1056_v24 }
 0x830   : > { %1180 = vpush %v1058_v29 }
 0x85d   : > { %s1177_s14 = spop %1176 }
 0x85e   : > { %v1035_v30 = vstv %s1177_s14  ;;  %s1179_s9 = spop %1178 }
 0x85f   : > { %v1047_v31 = vstv %s1179_s9 }
 0x860   : > { %v1048_v32 = vadd.f32 %v1047_v31, %v1035_v30 }
 0x861   : > { %s1181_s10 = spop %1180 }
 0x862   : > { %v1060_v33 = vstv %s1181_s10 }
 0x863   : > { %v1061_v34 = vsub.f32 %v1048_v32, %v1060_v33 }
 0x865   : > { %1063 = vst.msk [vmem:[%s287_s21] sm:$0x1] %vm1062_vm4, %v1061_v34 }
 0x866 PF: > { %s28_s1 = sadd.s32 1, %s1304_s1  }
 0x867   : > { %p25_p2 = scmp.ge.s32.totalorder %s28_s1, 4  }
 0x869   :  { %27 = sbr.rel (!%p25_p2) target bundleno = 26 (0x1a), region = 98 }

</bundles_post_ra>
